<compile_context>
chip_gen: v6e
topology: v6e:2x2x1
jax: 0.10.0
libtpu: 0.0.40
codegen_flags: <defaults>
</compile_context>

<pallas_src>
import functools

import jax
import jax.numpy as jnp
import numpy as np
from jax import lax
from jax.experimental import pallas as pl
from jax.experimental.pallas import tpu as pltpu


# ----------------------------------------------------------------------------
# Pallas kernel: one grid step = B batch samples, channel-major, lane-dense.
# ----------------------------------------------------------------------------
def _feature_block_kernel(H, W, B, PAD, Cp, F,
                          x_ref, mask_ref,
                          w1a_ref, b1a_ref,   # branch1 conv 1x1 (Cin -> F/2)
                          w1b_ref, b1b_ref,   # branch1 conv 1x1 (F/2 -> F)
                          w1c_ref, b1c_ref,   # branch1 conv 3x3 (F -> F), im2col
                          w2a_ref, b2a_ref,   # branch2 conv 3x3 (Cin -> 2F), im2col
                          w2b_ref, b2b_ref,   # branch2 conv 1x1 (2F -> F)
                          out_ref, hpad_ref):
    """x_ref:  (1, Cp, B*HWp) f32; each sample is [PAD zeros | img | PAD zeros].
    mask_ref:  (1, B*HWp) f32; 1.0 on image lanes, 0.0 on pad lanes.
    w*:        bf16 matrices (1x1: (Co, Ci); 3x3: (Co, 9*Ci), K = (ky, kx, c)).
    b*:        (Co, 1) f32 columns.
    out_ref:   (B, Cp + 2F, H*W) f32.
    hpad_ref:  (F, B*HWp) f32 scratch for branch-1's 3x3 taps."""
    HW = H * W
    HWp = HW + 2 * PAD
    Wfull = B * HWp
    L = Wfull - 2 * PAD        # "active" lanes: all B images + inter-sample pads

    # dx column masks, computed once (W is a power of two -> no vector divide).
    q = lax.broadcasted_iota(jnp.int32, (1, L), 1)
    col = lax.bitwise_and(q, W - 1)
    left_ok = col >= 1          # dx = -1 taps
    right_ok = col <= W - 2     # dx = +1 taps

    def mm(w_ref, a):
        # bf16 MXU operands, f32 accumulation: a single MXU pass per conv.
        return jnp.dot(w_ref[...], a.astype(jnp.bfloat16),
                       preferred_element_type=jnp.float32)

    def conv1x1(w_ref, b_ref, a):
        return jnp.maximum(mm(w_ref, a) + b_ref[...], 0.0)

    def im2col_3x3(load_tap):
        # (9*C, L) patch slab.  Tap order (ky, kx) row-major matches the
        # (Cout, 3, 3, C) -> (Cout, 9*C) weight reshape in the wrapper.
        # With per-sample zero lane pads >= W+1, out-of-image dy taps read
        # zeros, so only the dx = +/-1 taps need a (column) mask.
        blocks = []
        for dy in (-1, 0, 1):
            base = dy * W
            blocks.append(jnp.where(left_ok, load_tap(base - 1), 0.0))
            blocks.append(load_tap(base))
            blocks.append(jnp.where(right_ok, load_tap(base + 1), 0.0))
        return jnp.concatenate(blocks, axis=0)       # 8-aligned sublane concat

    def conv3x3(w_ref, b_ref, load_tap):
        return jnp.maximum(mm(w_ref, im2col_3x3(load_tap)) + b_ref[...], 0.0)

    def x_tap(s):
        return x_ref[0, :, PAD + s:PAD + s + L]

    def h_tap(s):
        return hpad_ref[:, PAD + s:PAD + s + L]

    # ---------------- branch 1: 1x1 -> 1x1 -> 3x3 ---------------------------
    xf = x_ref[0, :, :]                               # (Cp, Wfull)
    h = conv1x1(w1a_ref, b1a_ref, xf)                 # (F/2, Wfull)
    h = conv1x1(w1b_ref, b1b_ref, h)                  # (F,   Wfull)
    # Zero the pad lanes (relu(bias) leaks there) and park h with ONE
    # full-width aligned store so the 9 taps below are plain shifted loads.
    hpad_ref[...] = h * mask_ref[...]
    x1 = conv3x3(w1c_ref, b1c_ref, h_tap)             # (F, L)

    # ---------------- branch 2: 3x3 -> 1x1 ----------------------------------
    g = conv3x3(w2a_ref, b2a_ref, x_tap)              # (2F, L)
    x2 = conv1x1(w2b_ref, b2b_ref, g)                 # (F,  L)

    # ------------- concat([x, x1, x2]) along channels, per sample -----------
    # All stores start on 8-aligned sublanes and are full 128*k lane width.
    for b in range(B):
        src = b * HWp                                 # sample b inside the L slab
        out_ref[b, 0:Cp, :] = x_ref[0, :, src + PAD:src + PAD + HW]
        out_ref[b, Cp:Cp + F, :] = x1[:, src:src + HW]
        out_ref[b, Cp + F:Cp + 2 * F, :] = x2[:, src:src + HW]


# ----------------------------------------------------------------------------
# Wrapper: layout plumbing (reshape/transpose of small activation tensors).
# ----------------------------------------------------------------------------
def _replicated_spec(a):
    zeros = (0,) * a.ndim
    return pl.BlockSpec(a.shape, lambda g, _z=zeros: _z)


def dense_feature_block(x_nchw, params, F):
    """Fused DenseFeatureBlock forward: (N, Cin, H, W) -> (N, Cin + 2F, H, W)."""
    N, Cin, H, W = x_nchw.shape
    HW = H * W
    assert W & (W - 1) == 0, "kernel assumes W is a power of two"
    PAD = 64 if W + 1 <= 64 else 128       # per-sample zero lane pad (>= W+1)
    assert PAD >= W + 1
    HWp = HW + 2 * PAD
    assert HWp % 128 == 0, "per-sample slab width must stay 128-lane aligned"
    Cp = ((Cin + 7) // 8) * 8              # channel pad -> 8-aligned sublane concats

    # Batch packing: B samples lane-concatenated per grid step.  Exactly two
    # grid steps (one fat block per v7x TensorCore) unless the batch is 1 or
    # large enough that a per-step block would get too wide.
    B_MAX = 16
    G = 1 if N == 1 else max(2, -(-N // B_MAX))
    B = -(-N // G)
    Npad = G * B

    # channel-major, lane-dense, zero-padded slab: (G, Cp, B * (PAD+HW+PAD)).
    x = x_nchw.reshape(N, Cin, HW).astype(jnp.float32)
    x = jnp.pad(x, ((0, Npad - N), (0, Cp - Cin), (PAD, PAD)))
    x_slab = x.reshape(G, B, Cp, HWp).transpose(0, 2, 1, 3).reshape(G, Cp, B * HWp)

    # 1.0 on image lanes, 0.0 on pad lanes (zeros branch-1's pad lanes in-kernel).
    m = np.zeros((1, B * HWp), np.float32)
    for b in range(B):
        m[0, b * HWp + PAD:b * HWp + PAD + HW] = 1.0
    img_mask = jnp.asarray(m)

    bf16, f32 = jnp.bfloat16, jnp.float32
    # 1x1 convs: (Co, Ci, 1, 1) -> (Co, Ci) left-multiply matrices (bf16).
    w1a = jnp.pad(params["w1a"][:, :, 0, 0], ((0, 0), (0, Cp - Cin))).astype(bf16)
    w1b = params["w1b"][:, :, 0, 0].astype(bf16)
    w2b = params["w2b"][:, :, 0, 0].astype(bf16)
    # 3x3 convs: (Co, Ci, 3, 3) -> (Co, 9*Ci) im2col matrices, K = (ky, kx, c).
    w1c = jnp.transpose(params["w1c"], (0, 2, 3, 1)).reshape(F, 9 * F).astype(bf16)
    w2a = jnp.pad(params["w2a"], ((0, 0), (0, Cp - Cin), (0, 0), (0, 0)))
    w2a = jnp.transpose(w2a, (0, 2, 3, 1)).reshape(2 * F, 9 * Cp).astype(bf16)
    # biases as (Co, 1) f32 columns (broadcast along lanes in-kernel).
    b1a = params["b1a"].reshape(-1, 1).astype(f32)
    b1b = params["b1b"].reshape(-1, 1).astype(f32)
    b1c = params["b1c"].reshape(-1, 1).astype(f32)
    b2a = params["b2a"].reshape(-1, 1).astype(f32)
    b2b = params["b2b"].reshape(-1, 1).astype(f32)

    consts = (img_mask, w1a, b1a, w1b, b1b, w1c, b1c, w2a, b2a, w2b, b2b)

    Wfull = B * HWp
    L = Wfull - 2 * PAD
    macs = (Wfull * (Cp * (F // 2) + (F // 2) * F)
            + L * (9 * F * F + 9 * Cp * (2 * F) + (2 * F) * F))
    cost = pl.CostEstimate(
        flops=2 * G * macs,
        transcendentals=0,
        bytes_accessed=4 * (G * Cp * Wfull + Npad * (Cp + 2 * F) * HW)
        + sum(int(c.size) * c.dtype.itemsize for c in consts),
    )

    out = pl.pallas_call(
        functools.partial(_feature_block_kernel, H, W, B, PAD, Cp, F),
        out_shape=jax.ShapeDtypeStruct((Npad, Cp + 2 * F, HW), jnp.float32),
        grid=(G,),
        in_specs=[pl.BlockSpec((1, Cp, Wfull), lambda g: (g, 0, 0))]
        + [_replicated_spec(c) for c in consts],
        out_specs=pl.BlockSpec((B, Cp + 2 * F, HW), lambda g: (g, 0, 0)),
        scratch_shapes=[pltpu.VMEM((F, Wfull), jnp.float32)],
        compiler_params=pltpu.CompilerParams(
            dimension_semantics=("parallel",)),   # one fat block per TensorCore
        cost_estimate=cost,
    )(x_slab, *consts)

    out = out[:N]
    # Drop the channel-pad rows (kernel layout is [x padded to Cp | x1 | x2]).
    out = jnp.concatenate([out[:, :Cin], out[:, Cp:]], axis=1)
    return out.reshape(N, Cin + 2 * F, H, W)


def siamese_forward(x, y, params, F):
    """SiameseNet.forward: the shared extractor applied to both inputs.
    Both towers are stacked into one batch so a single pallas_call (and both
    v7x TensorCores) covers them; weights are shared by construction."""
    n = x.shape[0]
    feats = dense_feature_block(jnp.concatenate([x, y], axis=0), params, F)
    return feats[:n], feats[n:]


# ----------------------------------------------------------------------------
# Deterministic parameter construction (conv + eval-mode BN folding).
# ----------------------------------------------------------------------------
def _fold_bn(w, b, gamma, beta, mean, var, eps=1e-5):
    scale = gamma / jnp.sqrt(var + eps)
    w_f = w * scale[:, None, None, None]
    b_f = (b - mean) * scale + beta
    return w_f, b_f


def init_params(key, Cin, F):
    def conv_bn(k, cout, cin, ksz):
        ks = jax.random.split(k, 6)
        w = 0.1 * jax.random.normal(ks[0], (cout, cin, ksz, ksz), jnp.float32)
        b = 0.1 * jax.random.normal(ks[1], (cout,), jnp.float32)
        gamma = 1.0 + 0.1 * jax.random.normal(ks[2], (cout,), jnp.float32)
        beta = 0.1 * jax.random.normal(ks[3], (cout,), jnp.float32)
        mean = 0.1 * jax.random.normal(ks[4], (cout,), jnp.float32)
        var = jax.random.uniform(ks[5], (cout,), jnp.float32, 0.5, 1.5)
        return _fold_bn(w, b, gamma, beta, mean, var)

    keys = jax.random.split(key, 5)
    w1a, b1a = conv_bn(keys[0], F // 2, Cin, 1)
    w1b, b1b = conv_bn(keys[1], F, F // 2, 1)
    w1c, b1c = conv_bn(keys[2], F, F, 3)
    w2a, b2a = conv_bn(keys[3], 2 * F, Cin, 3)
    w2b, b2b = conv_bn(keys[4], F, 2 * F, 1)
    return dict(w1a=w1a, b1a=b1a, w1b=w1b, b1b=b1b, w1c=w1c, b1c=b1c,
                w2a=w2a, b2a=b2a, w2b=w2b, b2b=b2b)


# ----------------------------------------------------------------------------
# Pure-JAX reference with the same numerics as the kernel: bf16 MXU operands,
# f32 accumulation, f32 bias/ReLU (so the 1e-3 tolerance is a real check).
# ----------------------------------------------------------------------------
def reference_forward(x, p):
    def conv(inp, w, b, pad):
        y = lax.conv_general_dilated(
            inp.astype(jnp.bfloat16), w.astype(jnp.bfloat16),
            (1, 1), [(pad, pad), (pad, pad)],
            dimension_numbers=("NCHW", "OIHW", "NCHW"),
            preferred_element_type=jnp.float32)
        return y + b[None, :, None, None]

    relu = lambda t: jnp.maximum(t, 0.0)
    h = relu(conv(x, p["w1a"], p["b1a"], 0))
    h = relu(conv(h, p["w1b"], p["b1b"], 0))
    x1 = relu(conv(h, p["w1c"], p["b1c"], 1))
    g = relu(conv(x, p["w2a"], p["b2a"], 1))
    x2 = relu(conv(g, p["w2b"], p["b2b"], 0))
    return jnp.concatenate([x, x1, x2], axis=1)


if __name__ == "__main__":
    Cin, F = 4, 8
    N, H, W = 2, 16, 16

    key = jax.random.PRNGKey(0)
    kx, ky, kp = jax.random.split(key, 3)
    x = jax.random.normal(kx, (N, Cin, H, W), jnp.float32)
    y = jax.random.normal(ky, (N, Cin, H, W), jnp.float32)
    params = init_params(kp, Cin, F)

    fx, fy = siamese_forward(x, y, params, F)
    fx, fy = jax.block_until_ready((fx, fy))

    assert fx.shape == (N, Cin + 2 * F, H, W), fx.shape
    assert fy.shape == (N, Cin + 2 * F, H, W), fy.shape

    ref_x = reference_forward(x, params)
    ref_y = reference_forward(y, params)
    np.testing.assert_allclose(np.asarray(fx), np.asarray(ref_x),
                               rtol=1e-3, atol=1e-3)
    np.testing.assert_allclose(np.asarray(fy), np.asarray(ref_y),
                               rtol=1e-3, atol=1e-3)
    print("KERNEL_OK")
</pallas_src>

<mosaic_0001>
module attributes {stable_mosaic.version = 11 : i64} {
  func.func @_feature_block_kernel(%arg0: i32, %arg1: memref<1x8x768xf32, #tpu.memory_space<vmem>>, %arg2: memref<1x768xf32, #tpu.memory_space<vmem>>, %arg3: memref<4x8xbf16, #tpu.memory_space<vmem>>, %arg4: memref<4x1xf32, #tpu.memory_space<vmem>>, %arg5: memref<8x4xbf16, #tpu.memory_space<vmem>>, %arg6: memref<8x1xf32, #tpu.memory_space<vmem>>, %arg7: memref<8x72xbf16, #tpu.memory_space<vmem>>, %arg8: memref<8x1xf32, #tpu.memory_space<vmem>>, %arg9: memref<16x72xbf16, #tpu.memory_space<vmem>>, %arg10: memref<16x1xf32, #tpu.memory_space<vmem>>, %arg11: memref<8x16xbf16, #tpu.memory_space<vmem>>, %arg12: memref<8x1xf32, #tpu.memory_space<vmem>>, %arg13: memref<2x24x256xf32, #tpu.memory_space<vmem>>, %arg14: memref<8x768xf32, #tpu.memory_space<vmem>>) attributes {dimension_semantics = [#tpu.dimension_semantics<parallel>], iteration_bounds = array<i64: 2>, scalar_prefetch = 0 : i64, scratch_operands = 1 : i64, tpu.core_type = #tpu.core_type<tc>, window_params = [{transform_indices = @transform_0, window_bounds = array<i64: 1, 8, 768>}, {pipeline_mode = #tpu.pipeline_mode<synchronous>, transform_indices = @transform_1, window_bounds = array<i64: 1, 768>}, {pipeline_mode = #tpu.pipeline_mode<synchronous>, transform_indices = @transform_2, window_bounds = array<i64: 4, 8>}, {pipeline_mode = #tpu.pipeline_mode<synchronous>, transform_indices = @transform_3, window_bounds = array<i64: 4, 1>}, {pipeline_mode = #tpu.pipeline_mode<synchronous>, transform_indices = @transform_4, window_bounds = array<i64: 8, 4>}, {pipeline_mode = #tpu.pipeline_mode<synchronous>, transform_indices = @transform_5, window_bounds = array<i64: 8, 1>}, {pipeline_mode = #tpu.pipeline_mode<synchronous>, transform_indices = @transform_6, window_bounds = array<i64: 8, 72>}, {pipeline_mode = #tpu.pipeline_mode<synchronous>, transform_indices = @transform_7, window_bounds = array<i64: 8, 1>}, {pipeline_mode = #tpu.pipeline_mode<synchronous>, transform_indices = @transform_8, window_bounds = array<i64: 16, 72>}, {pipeline_mode = #tpu.pipeline_mode<synchronous>, transform_indices = @transform_9, window_bounds = array<i64: 16, 1>}, {pipeline_mode = #tpu.pipeline_mode<synchronous>, transform_indices = @transform_10, window_bounds = array<i64: 8, 16>}, {pipeline_mode = #tpu.pipeline_mode<synchronous>, transform_indices = @transform_11, window_bounds = array<i64: 8, 1>}, {transform_indices = @transform_12, window_bounds = array<i64: 2, 24, 256>}]} {
    %0 = tpu.iota {dimensions = array<i32: 1>} : vector<1x640xi32>
    %c15_i32 = arith.constant 15 : i32
    %1 = vector.broadcast %c15_i32 : i32 to vector<1x640xi32>
    %2 = arith.andi %0, %1 : vector<1x640xi32>
    %c1_i32 = arith.constant 1 : i32
    %3 = vector.broadcast %c1_i32 : i32 to vector<1x640xi32>
    %4 = arith.cmpi sge, %2, %3 : vector<1x640xi32>
    %c14_i32 = arith.constant 14 : i32
    %5 = vector.broadcast %c14_i32 : i32 to vector<1x640xi32>
    %6 = arith.cmpi sle, %2, %5 : vector<1x640xi32>
    %c0 = arith.constant 0 : index
    %c0_0 = arith.constant 0 : index
    %c0_1 = arith.constant 0 : index
    %7 = vector.load %arg1[%c0, %c0_0, %c0_1] : memref<1x8x768xf32, #tpu.memory_space<vmem>>, vector<1x8x768xf32>
    %8 = vector.shape_cast %7 : vector<1x8x768xf32> to vector<8x768xf32>
    %c0_2 = arith.constant 0 : index
    %c0_3 = arith.constant 0 : index
    %9 = vector.load %arg3[%c0_2, %c0_3] : memref<4x8xbf16, #tpu.memory_space<vmem>>, vector<4x8xbf16>
    %10 = arith.truncf %8 : vector<8x768xf32> to vector<8x768xbf16>
    %cst = arith.constant dense<0.000000e+00> : vector<4x768xf32>
    %11 = tpu.matmul %9, %10, %cst {dimension_numbers = #tpu.dot_dimension_numbers<[1], [0], [0], [1], [0, 0, 1, 1], [], []>} : vector<4x8xbf16>, vector<8x768xbf16>, vector<4x768xf32> -> vector<4x768xf32>
    %c0_4 = arith.constant 0 : index
    %c0_5 = arith.constant 0 : index
    %12 = vector.load %arg4[%c0_4, %c0_5] : memref<4x1xf32, #tpu.memory_space<vmem>>, vector<4x1xf32>
    %13 = vector.broadcast %12 : vector<4x1xf32> to vector<4x768xf32>
    %14 = arith.addf %11, %13 : vector<4x768xf32>
    %cst_6 = arith.constant 0.000000e+00 : f32
    %15 = vector.broadcast %cst_6 : f32 to vector<4x768xf32>
    %16 = arith.maximumf %14, %15 : vector<4x768xf32>
    %c0_7 = arith.constant 0 : index
    %c0_8 = arith.constant 0 : index
    %17 = vector.load %arg5[%c0_7, %c0_8] : memref<8x4xbf16, #tpu.memory_space<vmem>>, vector<8x4xbf16>
    %18 = arith.truncf %16 : vector<4x768xf32> to vector<4x768xbf16>
    %cst_9 = arith.constant dense<0.000000e+00> : vector<8x768xf32>
    %19 = tpu.matmul %17, %18, %cst_9 {dimension_numbers = #tpu.dot_dimension_numbers<[1], [0], [0], [1], [0, 0, 1, 1], [], []>} : vector<8x4xbf16>, vector<4x768xbf16>, vector<8x768xf32> -> vector<8x768xf32>
    %c0_10 = arith.constant 0 : index
    %c0_11 = arith.constant 0 : index
    %20 = vector.load %arg6[%c0_10, %c0_11] : memref<8x1xf32, #tpu.memory_space<vmem>>, vector<8x1xf32>
    %21 = vector.broadcast %20 : vector<8x1xf32> to vector<8x768xf32>
    %22 = arith.addf %19, %21 : vector<8x768xf32>
    %cst_12 = arith.constant 0.000000e+00 : f32
    %23 = vector.broadcast %cst_12 : f32 to vector<8x768xf32>
    %24 = arith.maximumf %22, %23 : vector<8x768xf32>
    %c0_13 = arith.constant 0 : index
    %c0_14 = arith.constant 0 : index
    %25 = vector.load %arg2[%c0_13, %c0_14] : memref<1x768xf32, #tpu.memory_space<vmem>>, vector<1x768xf32>
    %26 = vector.broadcast %25 : vector<1x768xf32> to vector<8x768xf32>
    %27 = arith.mulf %24, %26 : vector<8x768xf32>
    %c0_15 = arith.constant 0 : index
    %c0_16 = arith.constant 0 : index
    %28 = vector.load %arg14[%c0_15, %c0_16] : memref<8x768xf32, #tpu.memory_space<vmem>>, vector<8x768xf32>
    tpu.vector_store %arg14[%c0_15, %c0_16], %27 {strides = array<i32>} : memref<8x768xf32, #tpu.memory_space<vmem>>, vector<8x768xf32>,
    %c0_17 = arith.constant 0 : index
    %c47 = arith.constant 47 : index
    %29 = vector.load %arg14[%c0_17, %c47] : memref<8x768xf32, #tpu.memory_space<vmem>>, vector<8x640xf32>
    %cst_18 = arith.constant 0.000000e+00 : f32
    %30 = vector.shape_cast %4 : vector<1x640xi1> to vector<1x640xi1>
    %31 = vector.broadcast %30 : vector<1x640xi1> to vector<8x640xi1>
    %32 = vector.broadcast %cst_18 : f32 to vector<8x640xf32>
    %33 = arith.select %31, %29, %32 : vector<8x640xi1>, vector<8x640xf32>
    %c0_19 = arith.constant 0 : index
    %c48 = arith.constant 48 : index
    %34 = vector.load %arg14[%c0_19, %c48] : memref<8x768xf32, #tpu.memory_space<vmem>>, vector<8x640xf32>
    %c0_20 = arith.constant 0 : index
    %c49 = arith.constant 49 : index
    %35 = vector.load %arg14[%c0_20, %c49] : memref<8x768xf32, #tpu.memory_space<vmem>>, vector<8x640xf32>
    %cst_21 = arith.constant 0.000000e+00 : f32
    %36 = vector.shape_cast %6 : vector<1x640xi1> to vector<1x640xi1>
    %37 = vector.broadcast %36 : vector<1x640xi1> to vector<8x640xi1>
    %38 = vector.broadcast %cst_21 : f32 to vector<8x640xf32>
    %39 = arith.select %37, %35, %38 : vector<8x640xi1>, vector<8x640xf32>
    %c0_22 = arith.constant 0 : index
    %c63 = arith.constant 63 : index
    %40 = vector.load %arg14[%c0_22, %c63] : memref<8x768xf32, #tpu.memory_space<vmem>>, vector<8x640xf32>
    %cst_23 = arith.constant 0.000000e+00 : f32
    %41 = vector.shape_cast %4 : vector<1x640xi1> to vector<1x640xi1>
    %42 = vector.broadcast %41 : vector<1x640xi1> to vector<8x640xi1>
    %43 = vector.broadcast %cst_23 : f32 to vector<8x640xf32>
    %44 = arith.select %42, %40, %43 : vector<8x640xi1>, vector<8x640xf32>
    %c0_24 = arith.constant 0 : index
    %c64 = arith.constant 64 : index
    %45 = vector.load %arg14[%c0_24, %c64] : memref<8x768xf32, #tpu.memory_space<vmem>>, vector<8x640xf32>
    %c0_25 = arith.constant 0 : index
    %c65 = arith.constant 65 : index
    %46 = vector.load %arg14[%c0_25, %c65] : memref<8x768xf32, #tpu.memory_space<vmem>>, vector<8x640xf32>
    %cst_26 = arith.constant 0.000000e+00 : f32
    %47 = vector.shape_cast %6 : vector<1x640xi1> to vector<1x640xi1>
    %48 = vector.broadcast %47 : vector<1x640xi1> to vector<8x640xi1>
    %49 = vector.broadcast %cst_26 : f32 to vector<8x640xf32>
    %50 = arith.select %48, %46, %49 : vector<8x640xi1>, vector<8x640xf32>
    %c0_27 = arith.constant 0 : index
    %c79 = arith.constant 79 : index
    %51 = vector.load %arg14[%c0_27, %c79] : memref<8x768xf32, #tpu.memory_space<vmem>>, vector<8x640xf32>
    %cst_28 = arith.constant 0.000000e+00 : f32
    %52 = vector.shape_cast %4 : vector<1x640xi1> to vector<1x640xi1>
    %53 = vector.broadcast %52 : vector<1x640xi1> to vector<8x640xi1>
    %54 = vector.broadcast %cst_28 : f32 to vector<8x640xf32>
    %55 = arith.select %53, %51, %54 : vector<8x640xi1>, vector<8x640xf32>
    %c0_29 = arith.constant 0 : index
    %c80 = arith.constant 80 : index
    %56 = vector.load %arg14[%c0_29, %c80] : memref<8x768xf32, #tpu.memory_space<vmem>>, vector<8x640xf32>
    %c0_30 = arith.constant 0 : index
    %c81 = arith.constant 81 : index
    %57 = vector.load %arg14[%c0_30, %c81] : memref<8x768xf32, #tpu.memory_space<vmem>>, vector<8x640xf32>
    %cst_31 = arith.constant 0.000000e+00 : f32
    %58 = vector.shape_cast %6 : vector<1x640xi1> to vector<1x640xi1>
    %59 = vector.broadcast %58 : vector<1x640xi1> to vector<8x640xi1>
    %60 = vector.broadcast %cst_31 : f32 to vector<8x640xf32>
    %61 = arith.select %59, %57, %60 : vector<8x640xi1>, vector<8x640xf32>
    %62 = tpu.concatenate %33, %34, %39, %44, %45, %50, %55, %56, %61 in 0 : vector<8x640xf32>, vector<8x640xf32>, vector<8x640xf32>, vector<8x640xf32>, vector<8x640xf32>, vector<8x640xf32>, vector<8x640xf32>, vector<8x640xf32>, vector<8x640xf32> -> vector<72x640xf32>
    %c0_32 = arith.constant 0 : index
    %c0_33 = arith.constant 0 : index
    %63 = vector.load %arg7[%c0_32, %c0_33] : memref<8x72xbf16, #tpu.memory_space<vmem>>, vector<8x72xbf16>
    %64 = arith.truncf %62 : vector<72x640xf32> to vector<72x640xbf16>
    %cst_34 = arith.constant dense<0.000000e+00> : vector<8x640xf32>
    %65 = tpu.matmul %63, %64, %cst_34 {dimension_numbers = #tpu.dot_dimension_numbers<[1], [0], [0], [1], [0, 0, 1, 1], [], []>} : vector<8x72xbf16>, vector<72x640xbf16>, vector<8x640xf32> -> vector<8x640xf32>
    %c0_35 = arith.constant 0 : index
    %c0_36 = arith.constant 0 : index
    %66 = vector.load %arg8[%c0_35, %c0_36] : memref<8x1xf32, #tpu.memory_space<vmem>>, vector<8x1xf32>
    %67 = vector.broadcast %66 : vector<8x1xf32> to vector<8x640xf32>
    %68 = arith.addf %65, %67 : vector<8x640xf32>
    %cst_37 = arith.constant 0.000000e+00 : f32
    %69 = vector.broadcast %cst_37 : f32 to vector<8x640xf32>
    %70 = arith.maximumf %68, %69 : vector<8x640xf32>
    %c0_38 = arith.constant 0 : index
    %c0_39 = arith.constant 0 : index
    %c47_40 = arith.constant 47 : index
    %71 = vector.load %arg1[%c0_38, %c0_39, %c47_40] : memref<1x8x768xf32, #tpu.memory_space<vmem>>, vector<1x8x640xf32>
    %72 = vector.shape_cast %71 : vector<1x8x640xf32> to vector<8x640xf32>
    %cst_41 = arith.constant 0.000000e+00 : f32
    %73 = vector.shape_cast %4 : vector<1x640xi1> to vector<1x640xi1>
    %74 = vector.broadcast %73 : vector<1x640xi1> to vector<8x640xi1>
    %75 = vector.broadcast %cst_41 : f32 to vector<8x640xf32>
    %76 = arith.select %74, %72, %75 : vector<8x640xi1>, vector<8x640xf32>
    %c0_42 = arith.constant 0 : index
    %c0_43 = arith.constant 0 : index
    %c48_44 = arith.constant 48 : index
    %77 = vector.load %arg1[%c0_42, %c0_43, %c48_44] : memref<1x8x768xf32, #tpu.memory_space<vmem>>, vector<1x8x640xf32>
    %78 = vector.shape_cast %77 : vector<1x8x640xf32> to vector<8x640xf32>
    %c0_45 = arith.constant 0 : index
    %c0_46 = arith.constant 0 : index
    %c49_47 = arith.constant 49 : index
    %79 = vector.load %arg1[%c0_45, %c0_46, %c49_47] : memref<1x8x768xf32, #tpu.memory_space<vmem>>, vector<1x8x640xf32>
    %80 = vector.shape_cast %79 : vector<1x8x640xf32> to vector<8x640xf32>
    %cst_48 = arith.constant 0.000000e+00 : f32
    %81 = vector.shape_cast %6 : vector<1x640xi1> to vector<1x640xi1>
    %82 = vector.broadcast %81 : vector<1x640xi1> to vector<8x640xi1>
    %83 = vector.broadcast %cst_48 : f32 to vector<8x640xf32>
    %84 = arith.select %82, %80, %83 : vector<8x640xi1>, vector<8x640xf32>
    %c0_49 = arith.constant 0 : index
    %c0_50 = arith.constant 0 : index
    %c63_51 = arith.constant 63 : index
    %85 = vector.load %arg1[%c0_49, %c0_50, %c63_51] : memref<1x8x768xf32, #tpu.memory_space<vmem>>, vector<1x8x640xf32>
    %86 = vector.shape_cast %85 : vector<1x8x640xf32> to vector<8x640xf32>
    %cst_52 = arith.constant 0.000000e+00 : f32
    %87 = vector.shape_cast %4 : vector<1x640xi1> to vector<1x640xi1>
    %88 = vector.broadcast %87 : vector<1x640xi1> to vector<8x640xi1>
    %89 = vector.broadcast %cst_52 : f32 to vector<8x640xf32>
    %90 = arith.select %88, %86, %89 : vector<8x640xi1>, vector<8x640xf32>
    %c0_53 = arith.constant 0 : index
    %c0_54 = arith.constant 0 : index
    %c64_55 = arith.constant 64 : index
    %91 = vector.load %arg1[%c0_53, %c0_54, %c64_55] : memref<1x8x768xf32, #tpu.memory_space<vmem>>, vector<1x8x640xf32>
    %92 = vector.shape_cast %91 : vector<1x8x640xf32> to vector<8x640xf32>
    %c0_56 = arith.constant 0 : index
    %c0_57 = arith.constant 0 : index
    %c65_58 = arith.constant 65 : index
    %93 = vector.load %arg1[%c0_56, %c0_57, %c65_58] : memref<1x8x768xf32, #tpu.memory_space<vmem>>, vector<1x8x640xf32>
    %94 = vector.shape_cast %93 : vector<1x8x640xf32> to vector<8x640xf32>
    %cst_59 = arith.constant 0.000000e+00 : f32
    %95 = vector.shape_cast %6 : vector<1x640xi1> to vector<1x640xi1>
    %96 = vector.broadcast %95 : vector<1x640xi1> to vector<8x640xi1>
    %97 = vector.broadcast %cst_59 : f32 to vector<8x640xf32>
    %98 = arith.select %96, %94, %97 : vector<8x640xi1>, vector<8x640xf32>
    %c0_60 = arith.constant 0 : index
    %c0_61 = arith.constant 0 : index
    %c79_62 = arith.constant 79 : index
    %99 = vector.load %arg1[%c0_60, %c0_61, %c79_62] : memref<1x8x768xf32, #tpu.memory_space<vmem>>, vector<1x8x640xf32>
    %100 = vector.shape_cast %99 : vector<1x8x640xf32> to vector<8x640xf32>
    %cst_63 = arith.constant 0.000000e+00 : f32
    %101 = vector.shape_cast %4 : vector<1x640xi1> to vector<1x640xi1>
    %102 = vector.broadcast %101 : vector<1x640xi1> to vector<8x640xi1>
    %103 = vector.broadcast %cst_63 : f32 to vector<8x640xf32>
    %104 = arith.select %102, %100, %103 : vector<8x640xi1>, vector<8x640xf32>
    %c0_64 = arith.constant 0 : index
    %c0_65 = arith.constant 0 : index
    %c80_66 = arith.constant 80 : index
    %105 = vector.load %arg1[%c0_64, %c0_65, %c80_66] : memref<1x8x768xf32, #tpu.memory_space<vmem>>, vector<1x8x640xf32>
    %106 = vector.shape_cast %105 : vector<1x8x640xf32> to vector<8x640xf32>
    %c0_67 = arith.constant 0 : index
    %c0_68 = arith.constant 0 : index
    %c81_69 = arith.constant 81 : index
    %107 = vector.load %arg1[%c0_67, %c0_68, %c81_69] : memref<1x8x768xf32, #tpu.memory_space<vmem>>, vector<1x8x640xf32>
    %108 = vector.shape_cast %107 : vector<1x8x640xf32> to vector<8x640xf32>
    %cst_70 = arith.constant 0.000000e+00 : f32
    %109 = vector.shape_cast %6 : vector<1x640xi1> to vector<1x640xi1>
    %110 = vector.broadcast %109 : vector<1x640xi1> to vector<8x640xi1>
    %111 = vector.broadcast %cst_70 : f32 to vector<8x640xf32>
    %112 = arith.select %110, %108, %111 : vector<8x640xi1>, vector<8x640xf32>
    %113 = tpu.concatenate %76, %78, %84, %90, %92, %98, %104, %106, %112 in 0 : vector<8x640xf32>, vector<8x640xf32>, vector<8x640xf32>, vector<8x640xf32>, vector<8x640xf32>, vector<8x640xf32>, vector<8x640xf32>, vector<8x640xf32>, vector<8x640xf32> -> vector<72x640xf32>
    %c0_71 = arith.constant 0 : index
    %c0_72 = arith.constant 0 : index
    %114 = vector.load %arg9[%c0_71, %c0_72] : memref<16x72xbf16, #tpu.memory_space<vmem>>, vector<16x72xbf16>
    %115 = arith.truncf %113 : vector<72x640xf32> to vector<72x640xbf16>
    %cst_73 = arith.constant dense<0.000000e+00> : vector<16x640xf32>
    %116 = tpu.matmul %114, %115, %cst_73 {dimension_numbers = #tpu.dot_dimension_numbers<[1], [0], [0], [1], [0, 0, 1, 1], [], []>} : vector<16x72xbf16>, vector<72x640xbf16>, vector<16x640xf32> -> vector<16x640xf32>
    %c0_74 = arith.constant 0 : index
    %c0_75 = arith.constant 0 : index
    %117 = vector.load %arg10[%c0_74, %c0_75] : memref<16x1xf32, #tpu.memory_space<vmem>>, vector<16x1xf32>
    %118 = vector.broadcast %117 : vector<16x1xf32> to vector<16x640xf32>
    %119 = arith.addf %116, %118 : vector<16x640xf32>
    %cst_76 = arith.constant 0.000000e+00 : f32
    %120 = vector.broadcast %cst_76 : f32 to vector<16x640xf32>
    %121 = arith.maximumf %119, %120 : vector<16x640xf32>
    %c0_77 = arith.constant 0 : index
    %c0_78 = arith.constant 0 : index
    %122 = vector.load %arg11[%c0_77, %c0_78] : memref<8x16xbf16, #tpu.memory_space<vmem>>, vector<8x16xbf16>
    %123 = arith.truncf %121 : vector<16x640xf32> to vector<16x640xbf16>
    %cst_79 = arith.constant dense<0.000000e+00> : vector<8x640xf32>
    %124 = tpu.matmul %122, %123, %cst_79 {dimension_numbers = #tpu.dot_dimension_numbers<[1], [0], [0], [1], [0, 0, 1, 1], [], []>} : vector<8x16xbf16>, vector<16x640xbf16>, vector<8x640xf32> -> vector<8x640xf32>
    %c0_80 = arith.constant 0 : index
    %c0_81 = arith.constant 0 : index
    %125 = vector.load %arg12[%c0_80, %c0_81] : memref<8x1xf32, #tpu.memory_space<vmem>>, vector<8x1xf32>
    %126 = vector.broadcast %125 : vector<8x1xf32> to vector<8x640xf32>
    %127 = arith.addf %124, %126 : vector<8x640xf32>
    %cst_82 = arith.constant 0.000000e+00 : f32
    %128 = vector.broadcast %cst_82 : f32 to vector<8x640xf32>
    %129 = arith.maximumf %127, %128 : vector<8x640xf32>
    %c0_83 = arith.constant 0 : index
    %c0_84 = arith.constant 0 : index
    %c64_85 = arith.constant 64 : index
    %130 = vector.load %arg1[%c0_83, %c0_84, %c64_85] : memref<1x8x768xf32, #tpu.memory_space<vmem>>, vector<1x8x256xf32>
    %131 = vector.shape_cast %130 : vector<1x8x256xf32> to vector<8x256xf32>
    %c0_86 = arith.constant 0 : index
    %c0_87 = arith.constant 0 : index
    %c0_88 = arith.constant 0 : index
    %132 = vector.load %arg13[%c0_86, %c0_87, %c0_88] : memref<2x24x256xf32, #tpu.memory_space<vmem>>, vector<1x8x256xf32>
    %133 = vector.shape_cast %132 : vector<1x8x256xf32> to vector<8x256xf32>
    %134 = vector.shape_cast %131 : vector<8x256xf32> to vector<1x8x256xf32>
    tpu.vector_store %arg13[%c0_86, %c0_87, %c0_88], %134 {strides = array<i32>} : memref<2x24x256xf32, #tpu.memory_space<vmem>>, vector<1x8x256xf32>,
    %135 = vector.extract_strided_slice %70 {offsets = [0, 0], sizes = [8, 256], strides = [1, 1]} : vector<8x640xf32> to vector<8x256xf32>
    %c0_89 = arith.constant 0 : index
    %c8 = arith.constant 8 : index
    %c0_90 = arith.constant 0 : index
    %136 = vector.load %arg13[%c0_89, %c8, %c0_90] : memref<2x24x256xf32, #tpu.memory_space<vmem>>, vector<1x8x256xf32>
    %137 = vector.shape_cast %136 : vector<1x8x256xf32> to vector<8x256xf32>
    %138 = vector.shape_cast %135 : vector<8x256xf32> to vector<1x8x256xf32>
    tpu.vector_store %arg13[%c0_89, %c8, %c0_90], %138 {strides = array<i32>} : memref<2x24x256xf32, #tpu.memory_space<vmem>>, vector<1x8x256xf32>,
    %139 = vector.extract_strided_slice %129 {offsets = [0, 0], sizes = [8, 256], strides = [1, 1]} : vector<8x640xf32> to vector<8x256xf32>
    %c0_91 = arith.constant 0 : index
    %c16 = arith.constant 16 : index
    %c0_92 = arith.constant 0 : index
    %140 = vector.load %arg13[%c0_91, %c16, %c0_92] : memref<2x24x256xf32, #tpu.memory_space<vmem>>, vector<1x8x256xf32>
    %141 = vector.shape_cast %140 : vector<1x8x256xf32> to vector<8x256xf32>
    %142 = vector.shape_cast %139 : vector<8x256xf32> to vector<1x8x256xf32>
    tpu.vector_store %arg13[%c0_91, %c16, %c0_92], %142 {strides = array<i32>} : memref<2x24x256xf32, #tpu.memory_space<vmem>>, vector<1x8x256xf32>,
    %c0_93 = arith.constant 0 : index
    %c0_94 = arith.constant 0 : index
    %c448 = arith.constant 448 : index
    %143 = vector.load %arg1[%c0_93, %c0_94, %c448] : memref<1x8x768xf32, #tpu.memory_space<vmem>>, vector<1x8x256xf32>
    %144 = vector.shape_cast %143 : vector<1x8x256xf32> to vector<8x256xf32>
    %c1 = arith.constant 1 : index
    %c0_95 = arith.constant 0 : index
    %c0_96 = arith.constant 0 : index
    %145 = vector.load %arg13[%c1, %c0_95, %c0_96] : memref<2x24x256xf32, #tpu.memory_space<vmem>>, vector<1x8x256xf32>
    %146 = vector.shape_cast %145 : vector<1x8x256xf32> to vector<8x256xf32>
    %147 = vector.shape_cast %144 : vector<8x256xf32> to vector<1x8x256xf32>
    tpu.vector_store %arg13[%c1, %c0_95, %c0_96], %147 {strides = array<i32>} : memref<2x24x256xf32, #tpu.memory_space<vmem>>, vector<1x8x256xf32>,
    %148 = vector.extract_strided_slice %70 {offsets = [0, 384], sizes = [8, 256], strides = [1, 1]} : vector<8x640xf32> to vector<8x256xf32>
    %c1_97 = arith.constant 1 : index
    %c8_98 = arith.constant 8 : index
    %c0_99 = arith.constant 0 : index
    %149 = vector.load %arg13[%c1_97, %c8_98, %c0_99] : memref<2x24x256xf32, #tpu.memory_space<vmem>>, vector<1x8x256xf32>
    %150 = vector.shape_cast %149 : vector<1x8x256xf32> to vector<8x256xf32>
    %151 = vector.shape_cast %148 : vector<8x256xf32> to vector<1x8x256xf32>
    tpu.vector_store %arg13[%c1_97, %c8_98, %c0_99], %151 {strides = array<i32>} : memref<2x24x256xf32, #tpu.memory_space<vmem>>, vector<1x8x256xf32>,
    %152 = vector.extract_strided_slice %129 {offsets = [0, 384], sizes = [8, 256], strides = [1, 1]} : vector<8x640xf32> to vector<8x256xf32>
    %c1_100 = arith.constant 1 : index
    %c16_101 = arith.constant 16 : index
    %c0_102 = arith.constant 0 : index
    %153 = vector.load %arg13[%c1_100, %c16_101, %c0_102] : memref<2x24x256xf32, #tpu.memory_space<vmem>>, vector<1x8x256xf32>
    %154 = vector.shape_cast %153 : vector<1x8x256xf32> to vector<8x256xf32>
    %155 = vector.shape_cast %152 : vector<8x256xf32> to vector<1x8x256xf32>
    tpu.vector_store %arg13[%c1_100, %c16_101, %c0_102], %155 {strides = array<i32>} : memref<2x24x256xf32, #tpu.memory_space<vmem>>, vector<1x8x256xf32>,
    return
  }
  func.func @transform_0(%arg0: i32) -> (i32, i32, i32) {
    %c0_i32 = arith.constant 0 : i32
    %c0_i32_0 = arith.constant 0 : i32
    %c0_i32_1 = arith.constant 0 : i32
    return %arg0, %c0_i32, %c0_i32_0 : i32, i32, i32
  }
  func.func @transform_1(%arg0: i32) -> (i32, i32) {
    %c0_i32 = arith.constant 0 : i32
    %c0_i32_0 = arith.constant 0 : i32
    %c0_i32_1 = arith.constant 0 : i32
    return %c0_i32, %c0_i32_0 : i32, i32
  }
  func.func @transform_2(%arg0: i32) -> (i32, i32) {
    %c0_i32 = arith.constant 0 : i32
    %c0_i32_0 = arith.constant 0 : i32
    %c0_i32_1 = arith.constant 0 : i32
    return %c0_i32, %c0_i32_0 : i32, i32
  }
  func.func @transform_3(%arg0: i32) -> (i32, i32) {
    %c0_i32 = arith.constant 0 : i32
    %c0_i32_0 = arith.constant 0 : i32
    %c0_i32_1 = arith.constant 0 : i32
    return %c0_i32, %c0_i32_0 : i32, i32
  }
  func.func @transform_4(%arg0: i32) -> (i32, i32) {
    %c0_i32 = arith.constant 0 : i32
    %c0_i32_0 = arith.constant 0 : i32
    %c0_i32_1 = arith.constant 0 : i32
    return %c0_i32, %c0_i32_0 : i32, i32
  }
  func.func @transform_5(%arg0: i32) -> (i32, i32) {
    %c0_i32 = arith.constant 0 : i32
    %c0_i32_0 = arith.constant 0 : i32
    %c0_i32_1 = arith.constant 0 : i32
    return %c0_i32, %c0_i32_0 : i32, i32
  }
  func.func @transform_6(%arg0: i32) -> (i32, i32) {
    %c0_i32 = arith.constant 0 : i32
    %c0_i32_0 = arith.constant 0 : i32
    %c0_i32_1 = arith.constant 0 : i32
    return %c0_i32, %c0_i32_0 : i32, i32
  }
  func.func @transform_7(%arg0: i32) -> (i32, i32) {
    %c0_i32 = arith.constant 0 : i32
    %c0_i32_0 = arith.constant 0 : i32
    %c0_i32_1 = arith.constant 0 : i32
    return %c0_i32, %c0_i32_0 : i32, i32
  }
  func.func @transform_8(%arg0: i32) -> (i32, i32) {
    %c0_i32 = arith.constant 0 : i32
    %c0_i32_0 = arith.constant 0 : i32
    %c0_i32_1 = arith.constant 0 : i32
    return %c0_i32, %c0_i32_0 : i32, i32
  }
  func.func @transform_9(%arg0: i32) -> (i32, i32) {
    %c0_i32 = arith.constant 0 : i32
    %c0_i32_0 = arith.constant 0 : i32
    %c0_i32_1 = arith.constant 0 : i32
    return %c0_i32, %c0_i32_0 : i32, i32
  }
  func.func @transform_10(%arg0: i32) -> (i32, i32) {
    %c0_i32 = arith.constant 0 : i32
    %c0_i32_0 = arith.constant 0 : i32
    %c0_i32_1 = arith.constant 0 : i32
    return %c0_i32, %c0_i32_0 : i32, i32
  }
  func.func @transform_11(%arg0: i32) -> (i32, i32) {
    %c0_i32 = arith.constant 0 : i32
    %c0_i32_0 = arith.constant 0 : i32
    %c0_i32_1 = arith.constant 0 : i32
    return %c0_i32, %c0_i32_0 : i32, i32
  }
  func.func @transform_12(%arg0: i32) -> (i32, i32, i32) {
    %c0_i32 = arith.constant 0 : i32
    %c0_i32_0 = arith.constant 0 : i32
    %c0_i32_1 = arith.constant 0 : i32
    return %arg0, %c0_i32, %c0_i32_0 : i32, i32, i32
  }
}

</mosaic_0001>

<bundles_post_ra>
// kernel: tpu_custom_call.1
= control target key start
LH: loop header
LB: loop body
LE: loop exit
PB: predicated region body
PF: predicated region fallthrough
CT: control target
= control target key end

     0   :  { %s3717_s0 = inlined_call_operand.hbm [shape: f32[2,8,768], index: 0, kind: input, shape index: {}]   ;;  %s3718_s1 = inlined_call_operand.vmem [shape: f32[1,768], index: 1, kind: input, shape index: {}]   ;;  %s3719_s2 = inlined_call_operand.vmem [shape: bf16[4,8], index: 2, kind: input, shape index: {}]   ;;  %s3720_s3 = inlined_call_operand.vmem [shape: f32[4,1], index: 3, kind: input, shape index: {}]   ;;  %s3721_s4 = inlined_call_operand.vmem [shape: bf16[8,4], index: 4, kind: input, shape index: {}]   ;;  %s3722_s5 = inlined_call_operand.vmem [shape: f32[8,1], index: 5, kind: input, shape index: {}]   ;;  %s3723_s6 = inlined_call_operand.vmem [shape: bf16[8,72], index: 6, kind: input, shape index: {}]   ;;  %s3724_s7 = inlined_call_operand.vmem [shape: f32[8,1], index: 7, kind: input, shape index: {}]   ;;  %s3725_s8 = inlined_call_operand.vmem [shape: bf16[16,72], index: 8, kind: input, shape index: {}]   ;;  %s3726_s9 = inlined_call_operand.vmem [shape: f32[16,1], index: 9, kind: input, shape index: {}]   ;;  %s3727_s10 = inlined_call_operand.vmem [shape: bf16[8,16], index: 10, kind: input, shape index: {}]   ;;  %s3728_s11 = inlined_call_operand.vmem [shape: f32[8,1], index: 11, kind: input, shape index: {}]   ;;  %s3729_s12 = inlined_call_operand.hbm [shape: f32[4,24,256], index: 12, kind: output, shape index: {}]  }
   0x1   :  { %3796 = sst [smem:[#allocation16_spill]] %s3729_s12 }
   0x2   :  { %17 = vsyncpa [#allocation4], 0 }
   0x3   :  { %19 = vsyncpa [#allocation4 + $0x1], 0 }
   0x4   :  { %20 = vsyncpa [#allocation5], 0 }
   0x5   :  { %22 = vsyncpa [#allocation5 + $0x1], 0  ;;  %s2696_s21 = smov 0   ;;  %s2698_s22 = smov 0  }
   0x6   :  { %s2700_s23 = smov 0   ;;  %s2702_s24 = smov 0  }
   0x7 LB: > { %3797 = sst [smem:[#allocation9_spill]] %s2600_s21  ;;  %s2717_s25 = sadd.s32 4294967295, %s2612_s24   ;;  %s2612_s24 = sphi %s2702_s24, %s3975_s24   ;;  %s2608_s23 = sphi %s2700_s23, %s3977_s23   ;;  %s2604_s22 = sphi %s2698_s22, %s3979_s22   ;;  %s2600_s21 = sphi %s2696_s21, %s3978_s21  }
   0x8   : > { %3798 = sst [smem:[#allocation10_spill]] %s2608_s23  ;;  %s1991_s26 = sadd.s32 4294967294, %s2612_s24  }
   0x9   : > { %s2721_s27 = sadd.s32 1, %s2612_s24   ;;  %s35_s28 = sadd.s32 1, %s2608_s23 }
   0xa   : > { %3799 = sst [smem:[#allocation11_spill]] %s2721_s27  ;;  %s32_s29 = ssub.s32 %s2612_s24, %s2721_s27 }
   0xb   : > { %p42_p0 = scmp.ne.s32.totalorder %s2608_s23, %s2604_s22  ;;  %p33_p1 = scmp.eq.s32.totalorder %s32_s29, 0 }
   0xc   : > { %p43_p2 = scmp.eq.s32.totalorder %s2612_s24, 0  ;;  %p48_p3 = scmp.ne.s32.totalorder %s2604_s22, %s2600_s21 }
   0xd   : > { %p49_p4 = scmp.eq.s32.totalorder %s2717_s25, 0  ;;  %p303_p7 = scmp.eq.s32.totalorder %s2717_s25, 1 }
   0xe   : > { %s2733_s30 = scalar_select %p33_p1, %s2608_s23, %s35_s28  }
   0xf   : > { %p44_p5 = por %p43_p2, %p42_p0  ;;  %p2735_p6 = por %p49_p4, %p48_p3 }
  0x10   : > { %3800 = sst [smem:[#allocation12_spill]] %s2733_s30  ;;  %p309_p8 = scmp.eq.s32.totalorder %s1991_s26, 1 }
  0x11   : > { %s3801_s13 = scalar_select %p2735_p6, 1, 0 }
  0x12   : > { %p2218_p10 = scmp.lt.s32.totalorder %s2612_s24, 2  ;;  %p2742_p11 = por %p303_p7, %p42_p0 }
  0x13   : > { %p2746_p12 = por %p309_p8, %p48_p3  ;;  %s362_s16 = sand.u32 1, %s2608_s23  }
  0x14   : > { %s3802_s14 = scalar_select %p2742_p11, 1, 0 }
  0x15   : > { %s3803_s15 = scalar_select %p2746_p12, 1, 0 }
  0x16   : > { %s2202_s17 = smul.u32 768, %s2612_s24  ;;  %p2757_p13 = pnand %p2218_p10, %p44_p5 }
  0x17   : > { %3804 = sst [smem:[#allocation13_spill]] %s3803_s15  ;;  %s2201_s18 = smul.u32 48, %s362_s16 }
  0x18   : > { %s2755_s28 = scalar_lea.hbm %s3717_s0, %s2202_s17  ;;  %s363_s23 = scalar_lea.sflag [#allocation4], %s362_s16 }
  0x19   : > { %s366_s29 = scalar_lea.vmem [#allocation3], %s2201_s18  ;;  %s2520_s27 = scalar_lea.hbm %s2755_s28, 768 }
  0x1a   : > { %s374_s30 = sshll.u32 %s366_s29, 4  ;;  %p2521_p2 = scmp.ne.s32.totalorder %s2755_s28, %s2520_s27  ;;  %s375_s30 = int_to_ptr.vmem [resolvable:$true] %s374_s30 }
  0x1b   : > { %p2522_p3 = pneg %p2757_p13  ;;  %s2525_s20 = scalar_lea.hbm %s3717_s0, 1536 }
  0x1c   : > { %p2526_p5 = scmp.lt.s32.totalorder %s2755_s28, %s3717_s0  ;;  %p2527_p8 = scmp.lt.s32.totalorder %s2525_s20, %s2520_s27 }
  0x1d   : > { %p2523_p4 = pnand %p2522_p3, %p2521_p2 }
  0x1e   : > { %p2528_p10 = por %p2527_p8, %p2526_p5 }
  0x1f   : > { %p2524_p7 = pneg %p2523_p4 }
  0x21   : > { %p2529_p9 = pnand %p2528_p10, %p2524_p7 }
  0x23   : > { %2532 = shalt.err (!%p2529_p9)
}
  0x24   : > { %s2533_s18 = scalar_lea.vmem %s375_s30, 768  ;;  %s2614_s16 = smov [#allocation3]  }
  0x25   : > { %p2534_p0 = scmp.ne.s32.totalorder %s375_s30, %s2533_s18  ;;  %s2538_s29 = sshll.u32 %s2614_s16, 4  ;;  %s2539_s29 = int_to_ptr.vmem [resolvable:$false] %s2538_s29 }
  0x26   : > { %s2540_s12 = scalar_lea.vmem %s2539_s29, 1536  ;;  %p2541_p2 = scmp.lt.s32.totalorder %s375_s30, %s2539_s29 }
  0x27   : > { %p2536_p1 = pnand %p2534_p0, %p2522_p3  ;;  %p2542_p4 = scmp.lt.s32.totalorder %s2540_s12, %s2533_s18 }
  0x29   : > { %p2537_p12 = pneg %p2536_p1  ;;  %p2543_p11 = por %p2542_p4, %p2541_p2 }
  0x2b   : > { %p2544_p6 = pnand %p2543_p11, %p2537_p12 }
  0x2d   : > { %2547 = shalt.err (!%p2544_p6)
}
  0x2e   : > { %2213 = dma.hbm_to_vmem [thread:$0]  (!%p2757_p13), %s2755_s28, 768, %s375_s30, %s363_s23  }
  0x2f   : > { %p3806_p9 = scmp.lt.s32.totalorder %s2612_s24, 3  ;;  %p3807_p7 = scmp.ge.s32.totalorder %s2612_s24, 1 }
  0x31   : > { %p380_p5 = pnand %p3807_p7, %p3806_p9 }
  0x33   : > { %383 = sbr.rel (%p380_p5) target bundleno = 1125 (0x465), region = 68 }
  0x38   : > { %s2782_s21 = sand.u32 1, %s2604_s22   ;;  %p3808_p6 = scmp.ne.s32.totalorder %s3801_s13, 0 }
  0x39   : > { %s2203_s12 = smul.u32 48, %s2782_s21  ;;  %s386_s27 = scalar_lea.sflag [#allocation4], %s2782_s21 }
  0x3b   : > { %s2786_s15 = scalar_lea.vmem [#allocation3], %s2203_s12 }
  0x3c   : > { %2591 = dma.done.wait (%p3808_p6), %s386_s27, 768  }
  0x3d   : > { %2593 = vsyncadd (%p3808_p6), %s386_s27, 4294966528  ;;  %v3746_v0 = vmov 0   ;;  %v454_v1 = vld [vmem:[%s2786_s15 + $0x8] sm:$0xff]  ;;  %vm3738_vm0 = vcmask 1043456   ;;  %v2798_v2 = vld [vmem:[%s2786_s15 + $0x18] sm:$0xff]  ;;  %vm472_vm1 = vcmask 64512  }
  0x3e   : > { %527 = vmatprep.mubr.bf16.mxu0 %v3746_v0  ;;  %568 = vmatprep.mubr.bf16.mxu1 %v3746_v0  ;;  %v2801_v3 = vld [vmem:[%s2786_s15] sm:$0xff]  ;;  %v461_v4 = vpack.c.bf16 %v454_v1, %v454_v1  ;;  %v463_v5 = vpack.c.bf16 %v2798_v2, %v2798_v2  ;;  %v455_v7 = vld [vmem:[%s2786_s15 + $0x10] sm:$0xff]  ;;  %v2809_v8 = vld [vmem:[%s2786_s15 + $0x28] sm:$0xff]  ;;  %s2616_s19 = smov 47   ;;  %s2617_s20 = smov 49   ;;  %vm641_vm2 = vcmask 1041408  }
  0x3f   : > { %2267 = vset.pattern.permute.xlu0 %v3746_v0  ;;  %2518 = vset.pattern.permute.xlu1 %v3746_v0  ;;  %v460_v6 = vpack.c.bf16 %v2801_v3, %v2801_v3  ;;  %v462_v9 = vpack.c.bf16 %v455_v7, %v455_v7  ;;  %v465_v10 = vpack.c.bf16 %v2809_v8, %v2809_v8  ;;  %v2814_v11 = vld [vmem:[%s2786_s15 + $0x20] sm:$0xff]  ;;  %s2618_s18 = smov 48   ;;  %vm637_vm3 = vcmask 31744   ;;  %s2619_s12 = smov 63  }
  0x40   : > { %v466_v12 = vld [vmem:[%s3720_s3] sm:$0xf]  ;;  %1996 = vmatprep.subr.msk.bf16.mxu0 %vm3738_vm0, %v461_v4  ;;  %1998 = vmatprep.subr.msk.bf16.mxu1 %vm3738_vm0, %v463_v5  ;;  %v464_v14 = vpack.c.bf16 %v2814_v11, %v2814_v11  ;;  %v2268_v19 = vpack.i.bf16 %v454_v1, %v2801_v3  ;;  %v2273_v20 = vpack.i.bf16 %v2798_v2, %v455_v7  ;;  %s2620_s27 = smov 64   ;;  %vm3762_vm4 = vcmask 384000   ;;  %s2621_s13 = smov 65  }
  0x41   : > { %v478_v13 = vsel %vm3738_vm0, %v460_v6, 0  ;;  %v484_v15 = vsel %vm3738_vm0, %v462_v9, 0  ;;  %v459_v16 = vld [vmem:[%s3719_s2] sm:$0x3]  ;;  %469 = vperm.xlu0 %2267, %v466_v12   ;;  %v2840_v21 = vpack.i.bf16 %v455_v7, %v454_v1  ;;  %v2848_v22 = vpack.i.bf16 %v2798_v2, %v2801_v3  ;;  %s2622_s28 = smov 80   ;;  %s2623_s26 = smov 79  }
  0x42   : > { %510 = vmatpush1.bf16.msra.mxu0 %v478_v13  ;;  %551 = vmatpush1.bf16.msra.mxu1 %v484_v15  ;;  %v490_v17 = vsel %vm3738_vm0, %v464_v14, 0  ;;  %v631_v18 = vld [vmem:[%s3722_s5] sm:$0xff]  ;;  %vm3743_vm5 = vcmask 400384   ;;  %vm3774_vm6 = vcmask 392192   ;;  %s2624_s17 = smov 81   ;;  %vm3741_vm10 = vmmov 1  }
  0x43   : > { %2000 = vmatprep.subr.msk.bf16.mxu0 %vm3738_vm0, %v465_v10  ;;  %2269 = vrot.lane.b32.xlu1 %v2268_v19, %s2616_s19  ;;  %v624_v49 = vld [vmem:[%s3721_s4] sm:$0xf]  ;;  %vm3739_vm13 = vcmask 515072   ;;  %vm3740_vm14 = vcmask 523264   ;;  %s3968_s23 = sld [smem:[#allocation16_spill]]  ;;  %p3970_p12 = scmp.ne.s32.totalorder %s3802_s14, 0 }
  0x45   : > { %1997 = vmatmul.mubr.msk.bf16.vlgmr.msra.gmra.mxu0 %vm472_vm1, %v459_v16  ;;  %1999 = vmatmul.mubr.msk.bf16.vlgmr.msra.gmra.mxu1 %vm472_vm1, %v459_v16 }
  0x46   : > { %592 = vmatpush1.bf16.msra.mxu0 %v490_v17  ;;  %609 = vmatprep.mubr.bf16.mxu0 %v3746_v0 }
  0x47   : > { %634 = vperm.xlu0 %2267, %v631_v18   ;;  %692 = vmatprep.mubr.bf16.mxu1 %v3746_v0 }
  0x48   : > { %2279 = vrot.lane.b32.xlu1 %v2840_v21, %s2617_s20 }
  0x49   : > { %s3969_s30 = smov %s3968_s23 }
  0x4b   : > { %2274 = vrot.lane.b32.xlu0 %v2273_v20, %s2616_s19 }
  0x4c   : > { %2289 = vrot.lane.b32.xlu1 %v2848_v22, %s2617_s20 }
  0x4d   : > { %2001 = vmatmul.mubr.msk.bf16.vlgmr.msra.gmra.mxu0 %vm472_vm1, %v459_v16 }
  0x4e   : > { %733 = vmatprep.mubr.bf16.mxu0 %v3746_v0 }
  0x4f   : > { %2284 = vrot.lane.b32.xlu0 %v2840_v21, %s2618_s18 }
  0x50   : > { %2299 = vrot.lane.b32.xlu1 %v2840_v21, %s2619_s12 }
  0x53   : > { %2294 = vrot.lane.b32.xlu0 %v2848_v22, %s2618_s18 }
  0x57   : > { %2304 = vrot.lane.b32.xlu0 %v2840_v21, %s2620_s27 }
  0xb5   : > { %v2875_v59 = vpop.permute.xlu1 %2269 }
  0xb6   : > { %v3757_v61 = vunpack.i.h.bf16 %v2875_v59 }
  0xba   : > { %v2280_v1 = vpop.permute.xlu1 %2279 }
  0xbb   : > { %v2282_v5 = vunpack.i.h.bf16 %v2280_v1  ;;  %v2281_v6 = vunpack.i.l.bf16 %v2280_v1 }
  0xbc   : > { %v470_v23 = vpop.permute.xlu0 %469 }
  0xbd   : > { %v2889_v10 = vsel %vm3743_vm5, %v2281_v6, %v2282_v5 }
  0xbe   : > { %v2896_v14 = vpop.permute.xlu1 %2289 }
  0xbf   : > { %v3745_v16 = vunpack.i.h.bf16 %v2896_v14  ;;  %v2291_v17 = vunpack.i.l.bf16 %v2896_v14 }
  0xc1   : > { %v2905_v20 = vsel %vm3743_vm5, %v2291_v17, %v2281_v6 }
  0xc2   : > { %v2873_v58 = vpop.permute.xlu0 %634 }
  0xc6   : > { %v2877_v60 = vpop.permute.xlu0 %2274 }
  0xc7   : > { %v3748_v62 = vunpack.i.l.bf16 %v2877_v60 }
  0xc9   : > { %v2886_v63 = vsel %vm3762_vm4, %v3757_v61, %v3748_v62  ;;  %v3772_v61 = vmov 0.0  }
  0xca   : > { %v2285_v4 = vpop.permute.xlu0 %2284 }
  0xcb   : > { %v2287_v7 = vunpack.i.h.bf16 %v2285_v4  ;;  %v2286_v9 = vunpack.i.l.bf16 %v2285_v4 }
  0xcd   : > { %v2892_v12 = vsel %vm3774_vm6, %v2286_v9, %v2287_v7 }
  0xce   : > { %v2898_v15 = vpop.permute.xlu0 %2294 }
  0xcf   : > { %v3744_v18 = vunpack.i.h.bf16 %v2898_v15  ;;  %v2296_v19 = vunpack.i.l.bf16 %v2898_v15 }
 0x105   : > { %v529_v24 = vpop.f32.mrf.mxu0  ;;  %v570_v26 = vpop.f32.mrf.mxu1 }
 0x106   : > { %v530_v25 = vadd.f32 %v529_v24, %v470_v23  ;;  %v571_v27 = vadd.f32 %v570_v26, %v470_v23  ;;  %v2913_v24 = vsel %vm3774_vm6, %v2296_v19, %v2286_v9 }
 0x107   : > { %v531_v28 = vpop.f32.mrf.mxu0  ;;  %v572_v31 = vpop.f32.mrf.mxu1 }
 0x108   : > { %v618_v29 = vmax.f32 %v530_v25, 0.0  ;;  %v532_v30 = vadd.f32 %v531_v28, %v470_v23  ;;  %v620_v32 = vmax.f32 %v571_v27, 0.0  ;;  %v573_v33 = vadd.f32 %v572_v31, %v470_v23  ;;  %v789_v31 = vld [vmem:[%s3718_s1] sm:$0x3f] }
 0x109   : > { %v533_v34 = vpop.f32.mrf.mxu0  ;;  %v574_v37 = vpop.f32.mrf.mxu1  ;;  %v2918_v25 = vsel %vm3774_vm6, %v2287_v7, %v3744_v18  ;;  %v432_v28 = vlaneseq }
 0x10a   : > { %v625_v35 = vpack.c.bf16 %v618_v29, %v618_v29  ;;  %v619_v36 = vmax.f32 %v532_v30, 0.0  ;;  %v627_v38 = vpack.c.bf16 %v620_v32, %v620_v32  ;;  %v621_v39 = vmax.f32 %v573_v33, 0.0  ;;  %3810 = vst [vmem:[#allocation15_spill] sm:$0xff] %v2918_v25 }
 0x10b   : > { %v534_v40 = vpop.f32.mrf.mxu0  ;;  %v575_v42 = vpop.f32.mrf.mxu1  ;;  %v792_v29 = vshrl.u32 %v432_v28, 7 }
 0x10c   : > { %v626_v41 = vpack.c.bf16 %v619_v36, %v619_v36  ;;  %v628_v43 = vpack.c.bf16 %v621_v39, %v621_v39  ;;  %v649_v45 = vsel %vm641_vm2, %v627_v38, 0  ;;  %v643_v47 = vsel %vm641_vm2, %v625_v35, 0 }
 0x10d   : > { %v611_v44 = vpop.f32.mrf.mxu0  ;;  %v793_v30 = vsub.s32 0, %v792_v29  ;;  %v801_v32 = vsub.s32 2, %v792_v29  ;;  %v797_v33 = vsub.s32 1, %v792_v29  ;;  %v805_v37 = vsub.s32 3, %v792_v29 }
 0x10e   : > { %v612_v46 = vadd.f32 %v611_v44, %v470_v23  ;;  %2002 = vmatprep.subr.msk.bf16.mxu1 %vm641_vm2, %v626_v41  ;;  %2004 = vmatprep.subr.msk.bf16.mxu0 %vm641_vm2, %v628_v43 }
 0x10f   : > { %v613_v48 = vpop.f32.mrf.mxu0  ;;  %675 = vmatpush1.bf16.msra.mxu1 %v643_v47  ;;  %716 = vmatpush1.bf16.msra.mxu0 %v649_v45  ;;  %v794_v38 = vrot.slane %v789_v31, %v793_v30  ;;  %v802_v42 = vrot.slane %v789_v31, %v801_v32  ;;  %v798_v44 = vrot.slane %v789_v31, %v797_v33  ;;  %v813_v33 = vsub.s32 5, %v792_v29 }
 0x110   : > { %v622_v50 = vmax.f32 %v612_v46, 0.0  ;;  %v614_v51 = vadd.f32 %v613_v48, %v470_v23  ;;  %v2910_v23 = vsel %vm3743_vm5, %v2282_v5, %v3745_v16 }
 0x111   : > { %v615_v52 = vpop.f32.mrf.mxu0  ;;  %3809 = vst [vmem:[#allocation14_spill] sm:$0xff] %v2910_v23 }
 0x112   : > { %v629_v53 = vpack.c.bf16 %v622_v50, %v622_v50  ;;  %v623_v54 = vmax.f32 %v614_v51, 0.0  ;;  %2003 = vmatmul.mubr.msk.bf16.vlgmr.msra.gmra.mxu1 %vm637_vm3, %v624_v49  ;;  %2005 = vmatmul.mubr.msk.bf16.vlgmr.msra.gmra.mxu0 %vm637_vm3, %v624_v49  ;;  %v806_v50 = vrot.slane %v789_v31, %v805_v37  ;;  %v814_v37 = vrot.slane %v789_v31, %v813_v33 }
 0x113   : > { %774 = vmatprep.mubr.bf16.mxu1 %v3746_v0  ;;  %v616_v55 = vpop.f32.mrf.mxu0  ;;  %1185 = vmatprep.mubr.bf16.mxu0 %v3746_v0 }
 0x114   : > { %v630_v56 = vpack.c.bf16 %v623_v54, %v623_v54  ;;  %v655_v57 = vsel %vm641_vm2, %v629_v53, 0 }
 0x116   : > { %2006 = vmatprep.subr.msk.bf16.mxu1 %vm641_vm2, %v630_v56 }
 0x117   : > { %757 = vmatpush1.bf16.msra.mxu1 %v655_v57 }
 0x11a   : > { %2007 = vmatmul.mubr.msk.bf16.vlgmr.msra.gmra.mxu1 %vm637_vm3, %v624_v49  ;;  %vm3754_vm3 = vcmask 531456  }
 0x11b   : > { %1226 = vmatprep.mubr.bf16.mxu1 %v3746_v0 }
 0x1d2   : > { %v694_v34 = vpop.f32.mrf.mxu1  ;;  %v735_v36 = vpop.f32.mrf.mxu0 }
 0x1d3   : > { %v695_v35 = vadd.f32 %v694_v34, %v2873_v58  ;;  %v736_v39 = vadd.f32 %v735_v36, %v2873_v58 }
 0x1d4   : > { %v696_v40 = vpop.f32.mrf.mxu1  ;;  %v737_v45 = vpop.f32.mrf.mxu0 }
 0x1d5   : > { %v783_v41 = vmax.f32 %v695_v35, 0.0  ;;  %v697_v43 = vadd.f32 %v696_v40, %v2873_v58  ;;  %v785_v46 = vmax.f32 %v736_v39, 0.0  ;;  %v738_v47 = vadd.f32 %v737_v45, %v2873_v58 }
 0x1d6   : > { %v698_v48 = vpop.f32.mrf.mxu1  ;;  %v739_v51 = vpop.f32.mrf.mxu0  ;;  %v809_v35 = vsub.s32 4, %v792_v29  ;;  %v2468_v29 = vpack.i.bf16 %v2809_v8, %v2814_v11 }
 0x1d7   : > { %v784_v49 = vmax.f32 %v697_v43, 0.0  ;;  %v786_v52 = vmax.f32 %v738_v47, 0.0  ;;  %v821_v54 = vmul.f32 %v794_v38, %v783_v41  ;;  %v823_v55 = vmul.f32 %v802_v42, %v785_v46  ;;  %v3017_v42 = vpop.permute.xlu0 %2304 }
 0x1d8   : > { %v699_v53 = vpop.f32.mrf.mxu1  ;;  %v740_v57 = vpop.f32.mrf.mxu0  ;;  %v810_v39 = vrot.slane %v789_v31, %v809_v35  ;;  %v3020_v43 = vand.u32 127, %v432_v28 }
 0x1d9   : > { %v822_v56 = vmul.f32 %v798_v44, %v784_v49  ;;  %v824_v4 = vmul.f32 %v806_v50, %v786_v52  ;;  %v3015_v31 = vpop.permute.xlu1 %2299 }
 0x1da   : > { %v776_v1 = vpop.f32.mrf.mxu1  ;;  %v434_v44 = vadd.s32 128, %v3020_v43  ;;  %v438_v46 = vand.u32 15, %v3020_v43  ;;  %v436_v27 = vadd.s32 384, %v3020_v43 }
 0x1db   : > { %v2318_v5 = vpack.i.bf16 %v823_v55, %v822_v56  ;;  %v2308_v6 = vpack.i.bf16 %v822_v56, %v821_v54  ;;  %v2313_v17 = vpack.i.bf16 %v824_v4, %v823_v55  ;;  %v2333_v30 = vpack.i.bf16 %v824_v4, %v821_v54 }
 0x1dc   : > { %v778_v7 = vpop.f32.mrf.mxu1  ;;  %v777_v34 = vadd.f32 %v776_v1, %v2873_v58  ;;  %v439_v49 = vand.u32 15, %v434_v44  ;;  %vm3031_vm7 = vcmp.le.s32.totalorder %v438_v46, 14  ;;  %vm3074_vm12 = vcmp.ge.s32.totalorder %v438_v46, 1 }
 0x1dd   : > { %2319 = vrot.lane.b32.xlu0 %v2318_v5, %s2617_s20  ;;  %2309 = vrot.lane.b32.xlu1 %v2308_v6, %s2616_s19  ;;  %v779_v32 = vadd.f32 %v778_v7, %v2873_v58  ;;  %vm3095_vm15 = vmpackc.low %vm3741_vm10, %vm3074_vm12  ;;  %v441_v0 = vand.u32 15, %v436_v27 }
 0x1de   : > { %v780_v9 = vpop.f32.mrf.mxu1  ;;  %v787_v38 = vmax.f32 %v777_v34, 0.0  ;;  %vm3040_vm8 = vcmp.le.s32.totalorder %v439_v49, 14  ;;  %vm3055_vm9 = vcmp.ge.s32.totalorder %v439_v49, 1  ;;  %vm3133_vm2 = vmpackc.low %vm3031_vm7, %vm3741_vm10 }
 0x1df   : > { %v788_v36 = vmax.f32 %v779_v32, 0.0  ;;  %vm3070_vm11 = vmpackc.low %vm3741_vm10, %vm3055_vm9 }
 0x1e0   : > { %v781_v19 = vpop.f32.mrf.mxu1  ;;  %v825_v41 = vmul.f32 %v810_v39, %v787_v38  ;;  %vm3108_vm1 = vmpackc.low %vm3040_vm8, %vm3741_vm10 }
 0x1e1   : > { %2324 = vrot.lane.b32.xlu0 %v2318_v5, %s2618_s18  ;;  %2314 = vrot.lane.b32.xlu1 %v2313_v17, %s2616_s19  ;;  %v826_v40 = vmul.f32 %v814_v37, %v788_v36  ;;  %v3815_v19 = vmov 0  ;;  %v3817_v36 = vmov 0  ;;  %v3819_v37 = vmov 0  ;;  %vm3752_vm10 = vmpackc.low %vm3074_vm12, %vm3031_vm7 }
 0x1e2   : > { %v3816_v19 = vsel %vm3055_vm9, 4294967295, %v3815_v19  ;;  %v3818_v36 = vsel %vm3070_vm11, 4294967295, %v3817_v36  ;;  %v3820_v37 = vsel %vm3074_vm12, 4294967295, %v3819_v37  ;;  %vm3770_vm12 = vmmov 0  }
 0x1e3   : > { %v2408_v58 = vpack.i.bf16 %v826_v40, %v825_v41 }
 0x1e5   : > { %2334 = vrot.lane.b32.xlu0 %v2333_v30, %s2618_s18  ;;  %2329 = vrot.lane.b32.xlu1 %v2333_v30, %s2617_s20 }
 0x1e9   : > { %2344 = vrot.lane.b32.xlu0 %v2318_v5, %s2620_s27  ;;  %2339 = vrot.lane.b32.xlu1 %v2318_v5, %s2619_s12 }
 0x1ed   : > { %2364 = vrot.lane.b32.xlu0 %v2318_v5, %s2621_s13  ;;  %2349 = vrot.lane.b32.xlu1 %v2333_v30, %s2619_s12 }
 0x1f1   : > { %2374 = vrot.lane.b32.xlu0 %v2333_v30, %s2621_s13  ;;  %2354 = vrot.lane.b32.xlu1 %v2333_v30, %s2620_s27 }
 0x1f5   : > { %2384 = vrot.lane.b32.xlu0 %v2318_v5, %s2622_s28  ;;  %2359 = vrot.lane.b32.xlu1 %v2318_v5, %s2623_s26 }
 0x1f9   : > { %2394 = vrot.lane.b32.xlu0 %v2333_v30, %s2622_s28  ;;  %2369 = vrot.lane.b32.xlu1 %v2333_v30, %s2623_s26 }
 0x1fd   : > { %2409 = vrot.lane.b32.xlu0 %v2408_v58, %s2617_s20  ;;  %2379 = vrot.lane.b32.xlu1 %v2318_v5, %s2624_s17 }
 0x201   : > { %2414 = vrot.lane.b32.xlu0 %v2408_v58, %s2618_s18  ;;  %2389 = vrot.lane.b32.xlu1 %v2333_v30, %s2624_s17 }
 0x205   : > { %2424 = vrot.lane.b32.xlu0 %v2408_v58, %s2620_s27  ;;  %2399 = vrot.lane.b32.xlu1 %v2408_v58, %s2616_s19 }
 0x209   : > { %2429 = vrot.lane.b32.xlu0 %v2408_v58, %s2623_s26  ;;  %2404 = vrot.lane.b32.xlu1 %v2848_v22, %s2619_s12 }
 0x20d   : > { %2444 = vrot.lane.b32.xlu0 %v2408_v58, %s2622_s28  ;;  %2419 = vrot.lane.b32.xlu1 %v2408_v58, %s2619_s12 }
 0x211   : > { %2449 = vrot.lane.b32.xlu0 %v2848_v22, %s2620_s27  ;;  %2434 = vrot.lane.b32.xlu1 %v2408_v58, %s2621_s13 }
 0x215   : > { %2459 = vrot.lane.b32.xlu0 %v2840_v21, %s2621_s13  ;;  %2439 = vrot.lane.b32.xlu1 %v2408_v58, %s2624_s17 }
 0x219   : > { %1344 = vrot.lane.b32.xlu0 %v2801_v3, %s2621_s13  ;;  %2454 = vrot.lane.b32.xlu1 %v2840_v21, %s2623_s26 }
 0x21d   : > { %2474 = vrot.lane.b32.xlu0 %v2840_v21, %s2624_s17  ;;  %2464 = vrot.lane.b32.xlu1 %v2848_v22, %s2623_s26  ;;  %v2508_v22 = vpack.i.bf16 %v2814_v11, %v2798_v2  ;;  %v1128_v2 = vld [vmem:[%s3724_s7] sm:$0xff] }
 0x221   : > { %1290 = vrot.lane.b32.xlu0 %v2801_v3, %s2624_s17  ;;  %2469 = vrot.lane.b32.xlu1 %v2468_v29, %s2616_s19  ;;  %s2204_s19 = smul.u32 96, %s2782_s21 }
 0x225   : > { %2484 = vrot.lane.b32.xlu0 %v2468_v29, %s2617_s20  ;;  %2479 = vrot.lane.b32.xlu1 %v2840_v21, %s2622_s28  ;;  %v1723_v21 = vld [vmem:[%s3728_s11] sm:$0xff]  ;;  %s3640_s20 = scalar_lea.vmem [#allocation6], %s2204_s19 }
 0x226   : > { %s1918_s16 = sshll.u32 %s3640_s20, 4  ;;  %s3672_s16 = int_to_ptr.vmem [resolvable:$true] %s1918_s16 }
 0x229   : > { %2494 = vrot.lane.b32.xlu0 %v2468_v29, %s2619_s12  ;;  %1452 = vrot.lane.b32.xlu1 %v2801_v3, %s2622_s28  ;;  %v1545_v3 = vld [vmem:[%s3726_s9] sm:$0xff] }
 0x22d   : > { %1325 = vrot.lane.b32.xlu0 %v2814_v11, %s2623_s26  ;;  %2489 = vrot.lane.b32.xlu1 %v2468_v29, %s2618_s18  ;;  %v1546_v11 = vld [vmem:[%s3726_s9 + $0x8] sm:$0xff]  ;;  %s2205_s18 = smul.u32 1536, %s2717_s25  ;;  %s1904_s25 = scalar_lea.sflag [#allocation5], %s2782_s21 }
 0x231   : > { %2509 = vrot.lane.b32.xlu0 %v2508_v22, %s2624_s17  ;;  %2499 = vrot.lane.b32.xlu1 %v2468_v29, %s2620_s27 }
 0x235   : > { %1327 = vrot.lane.b32.xlu0 %v2809_v8, %s2623_s26  ;;  %2504 = vrot.lane.b32.xlu1 %v2508_v22, %s2621_s13  ;;  %s2628_s26 = smov [#allocation6]  }
 0x239   : > { %1300 = vrot.lane.b32.xlu0 %v2809_v8, %s2624_s17  ;;  %2514 = vrot.lane.b32.xlu1 %v2508_v22, %s2622_s28  ;;  %s2552_s17 = sshll.u32 %s2628_s26, 4  ;;  %s2553_s17 = int_to_ptr.vmem [resolvable:$false] %s2552_s17 }
 0x23a   : > { %s2554_s19 = scalar_lea.vmem %s2553_s17, 3072  ;;  %p2555_p1 = scmp.lt.s32.totalorder %s3672_s16, %s2553_s17 }
 0x23d   : > { %1549 = vperm.xlu0 %2267, %v1545_v3   ;;  %1354 = vrot.lane.b32.xlu1 %v2809_v8, %s2621_s13  ;;  %s3670_s13 = scalar_lea.hbm %s3968_s23, %s2205_s18 }
 0x241   : > { %1131 = vperm.xlu0 %2267, %v1128_v2   ;;  %1462 = vrot.lane.b32.xlu1 %v2809_v8, %s2622_s28  ;;  %s2548_s28 = scalar_lea.vmem %s3672_s16, 1536 }
 0x242   : > { %p2549_p11 = scmp.ne.s32.totalorder %s3672_s16, %s2548_s28  ;;  %p2556_p3 = scmp.lt.s32.totalorder %s2554_s19, %s2548_s28 }
 0x244   : > { %p2550_p13 = pnand %p2549_p11, %p3970_p12  ;;  %p2557_p8 = por %p2556_p3, %p2555_p1 }
 0x245   : > { %1554 = vperm.xlu1 %2518, %v1546_v11  }
 0x246   : > { %p2551_p0 = pneg %p2550_p13 }
 0x248   : > { %p2558_p10 = pnand %p2557_p8, %p2551_p0 }
 0x249   : > { %1726 = vperm.xlu1 %2518, %v1723_v21   ;;  %v3821_v21 = vmov 0 }
 0x24a   : > { %v3822_v21 = vsel %vm3095_vm15, 4294967295, %v3821_v21 }
 0x24f   : > { %v3023_v8 = vpop.permute.xlu0 %2319  ;;  %v2310_v45 = vpop.permute.xlu1 %2309 }
 0x250   : > { %v2312_v47 = vunpack.i.h.bf16 %v2310_v45  ;;  %v2311_v48 = vunpack.i.l.bf16 %v2310_v45  ;;  %v3761_v1 = vunpack.i.h.bf16 %v3023_v8  ;;  %v2321_v4 = vunpack.i.l.bf16 %v3023_v8 }
 0x252   : > { %v1018_v50 = vsel %vm3762_vm4, %v2311_v48, %v2312_v47  ;;  %v991_v35 = vsel %vm3743_vm5, %v2321_v4, %v3761_v1 }
 0x253   : > { %v3027_v51 = vpop.permute.xlu0 %2324  ;;  %v3029_v52 = vpop.permute.xlu1 %2314  ;;  %v1028_v56 = vsel %vm3031_vm7, %v1018_v50, 0.0 }
 0x254   : > { %v2327_v28 = vunpack.i.h.bf16 %v3027_v51  ;;  %v2326_v54 = vunpack.i.l.bf16 %v3027_v51  ;;  %v2316_v55 = vunpack.i.l.bf16 %v3029_v52  ;;  %v1123_v17 = vpack.c.bf16 %v1028_v56, %v1028_v56 }
 0x256   : > { %v1019_v5 = vsel %vm3762_vm4, %v2312_v47, %v2316_v55  ;;  %v1093_v30 = vsel %vm3774_vm6, %v2326_v54, %v2327_v28  ;;  %v1139_v29 = vsel %vm3738_vm0, %v1123_v17, 0  ;;  %v3823_v47 = vmov 0 }
 0x257   : > { %v1029_v6 = vsel %vm3040_vm8, %v1019_v5, 0.0  ;;  %v3051_v7 = vpop.permute.xlu0 %2334  ;;  %v3053_v9 = vpop.permute.xlu1 %2329  ;;  %v2010_v38 = vpack.c.bf16 %v1093_v30, %v991_v35  ;;  %v3824_v47 = vsel %vm3108_vm1, 4294967295, %v3823_v47 }
 0x258   : > { %v2336_v32 = vunpack.i.l.bf16 %v3051_v7  ;;  %v2331_v33 = vunpack.i.l.bf16 %v3053_v9  ;;  %v1124_v34 = vpack.c.bf16 %v1029_v6, %v1029_v6 }
 0x25a   : > { %v1092_v39 = vsel %vm3774_vm6, %v2336_v32, %v2326_v54  ;;  %v990_v40 = vsel %vm3743_vm5, %v2331_v33, %v2321_v4  ;;  %2008 = vmatprep.subr.msk.bf16.mxu0 %vm3738_vm0, %v1124_v34  ;;  %v3825_v33 = vmov 0  ;;  %vm3763_vm0 = vcmask 646144  }
 0x25b   : > { %v3081_v41 = vpop.permute.xlu0 %2344  ;;  %v3083_v58 = vpop.permute.xlu1 %2339  ;;  %1160 = vmatpush1.bf16.msra.mxu0 %v1139_v29  ;;  %v2013_v44 = vpack.c.bf16 %v1092_v39, %v990_v40  ;;  %v3826_v33 = vsel %vm3133_vm2, 4294967295, %v3825_v33  ;;  %vm3755_vm5 = vcmask 662528  }
 0x25c   : > { %v3760_v22 = vunpack.i.h.bf16 %v3081_v41  ;;  %v2346_v3 = vunpack.i.l.bf16 %v3081_v41  ;;  %v3759_v2 = vunpack.i.h.bf16 %v3083_v58  ;;  %v2341_v11 = vunpack.i.l.bf16 %v3083_v58  ;;  %2011 = vmatprep.subr.msk.bf16.mxu0 %vm3070_vm11, %v2010_v38 }
 0x25e   : > { %v1070_v45 = vsel %vm3740_vm14, %v2346_v3, %v3760_v22  ;;  %v963_v46 = vsel %vm3739_vm13, %v2341_v11, %v3759_v2 }
 0x25f   : > { %v2016_v48 = vpack.c.bf16 %v963_v46, %v1070_v45  ;;  %v3112_v49 = vpop.permute.xlu0 %2364  ;;  %v3114_v50 = vpop.permute.xlu1 %2349  ;;  %2014 = vmatpush1.bf16.msk.msra.mxu0 %vm3095_vm15, %v2013_v44 }
 0x260   : > { %v2351_v54 = vunpack.i.l.bf16 %v3114_v50  ;;  %v3749_v6 = vunpack.i.h.bf16 %v3112_v49  ;;  %v2366_v17 = vunpack.i.l.bf16 %v3112_v49 }
 0x261   : > { %2017 = vmatprep.subr.msk.bf16.mxu0 %vm3108_vm1, %v2016_v48 }
 0x262   : > { %v962_v30 = vsel %vm3739_vm13, %v2351_v54, %v2341_v11  ;;  %v935_v29 = vsel %vm3754_vm3, %v2366_v17, %v3749_v6  ;;  %vm3753_vm13 = vmpackc.low %vm3055_vm9, %vm3040_vm8  ;;  %v435_v54 = vadd.s32 256, %v3020_v43 }
 0x263   : > { %v3121_v56 = vpop.permute.xlu0 %2374  ;;  %v3123_v4 = vpop.permute.xlu1 %2354 }
 0x264   : > { %v2356_v5 = vunpack.i.l.bf16 %v3123_v4 }
 0x266   : > { %v1069_v32 = vsel %vm3740_vm14, %v2356_v5, %v2346_v3  ;;  %v2376_v3 = vunpack.i.l.bf16 %v3121_v56  ;;  %vm3756_vm14 = vcmask 654336  }
 0x267   : > { %v2019_v34 = vpack.c.bf16 %v962_v30, %v1069_v32  ;;  %v3137_v35 = vpop.permute.xlu0 %2384  ;;  %v3139_v38 = vpop.permute.xlu1 %2359 }
 0x268   : > { %v3758_v39 = vunpack.i.h.bf16 %v3139_v38  ;;  %v2361_v40 = vunpack.i.l.bf16 %v3139_v38  ;;  %v934_v5 = vsel %vm3754_vm3, %v2376_v3, %v2366_v17  ;;  %v3750_v30 = vunpack.i.h.bf16 %v3137_v35 }
 0x269   : > { %2020 = vmatpush1.bf16.msk.msra.mxu0 %vm3133_vm2, %v2019_v34  ;;  %v2386_v32 = vunpack.i.l.bf16 %v3137_v35  ;;  %v437_v17 = vadd.s32 512, %v3020_v43  ;;  %vm3842_vm2 = vmmov 1  }
 0x26a   : > { %v907_v11 = vsel %vm3763_vm0, %v2361_v40, %v3758_v39 }
 0x26b   : > { %v2022_v44 = vpack.c.bf16 %v935_v29, %v907_v11  ;;  %v3156_v45 = vpop.permute.xlu0 %2394  ;;  %v3158_v46 = vpop.permute.xlu1 %2369  ;;  %v442_v62 = vand.u32 15, %v437_v17  ;;  %v3829_v17 = vmov 0 }
 0x26c   : > { %v2371_v48 = vunpack.i.l.bf16 %v3158_v46 }
 0x26d   : > { %2023 = vmatprep.subr.msk.bf16.mxu0 %vm3753_vm13, %v2022_v44  ;;  %vm3212_vm13 = vcmp.le.s32.totalorder %v441_v0, 14  ;;  %vm3216_vm3 = vcmp.le.s32.totalorder %v442_v62, 14 }
 0x26e   : > { %v906_v34 = vsel %vm3763_vm0, %v2371_v48, %v2361_v40  ;;  %v2317_v40 = vunpack.i.h.bf16 %v3029_v52  ;;  %v1047_v48 = vsel %vm3756_vm14, %v2386_v32, %v3750_v30  ;;  %v3830_v17 = vsel %vm3212_vm13, 4294967295, %v3829_v17 }
 0x26f   : > { %v2025_v29 = vpack.c.bf16 %v934_v5, %v906_v34  ;;  %v3175_v11 = vpop.permute.xlu0 %2409  ;;  %v3177_v44 = vpop.permute.xlu1 %2379  ;;  %v2396_v5 = vunpack.i.l.bf16 %v3156_v45  ;;  %v440_v34 = vand.u32 15, %v435_v54  ;;  %v3827_v54 = vmov 0 }
 0x270   : > { %v3751_v3 = vunpack.i.h.bf16 %v3177_v44  ;;  %v2381_v18 = vunpack.i.l.bf16 %v3177_v44  ;;  %vm3254_vm0 = vcmp.ge.s32.totalorder %v442_v62, 1 }
 0x271   : > { %2026 = vmatpush1.bf16.msk.msra.mxu0 %vm3752_vm10, %v2025_v29  ;;  %v1020_v29 = vsel %vm3762_vm4, %v2316_v55, %v2317_v40  ;;  %v1046_v30 = vsel %vm3756_vm14, %v2396_v5, %v2386_v32  ;;  %vm3206_vm10 = vcmp.le.s32.totalorder %v440_v34, 14  ;;  %vm3230_vm14 = vcmp.ge.s32.totalorder %v441_v0, 1  ;;  %v1858_v55 = vld [vmem:[%s2786_s15] sm:$0xff] }
 0x272   : > { %v869_v43 = vsel %vm3755_vm5, %v2381_v18, %v3751_v3  ;;  %v3828_v54 = vsel %vm3206_vm10, 4294967295, %v3827_v54  ;;  %vm3273_vm1 = vmpackc.low %vm3842_vm2, %vm3230_vm14  ;;  %1864 = vrot.lane.b32.xlu0 %v1858_v55, %s2620_s27 }
 0x273   : > { %v2028_v16 = vpack.c.bf16 %v1047_v48, %v869_v43  ;;  %v2415_v26 = vpop.permute.xlu0 %2414  ;;  %v3196_v13 = vpop.permute.xlu1 %2389  ;;  %v2332_v43 = vunpack.i.h.bf16 %v3053_v9 }
 0x274   : > { %v2391_v6 = vunpack.i.l.bf16 %v3196_v13 }
 0x275   : > { %2029 = vmatprep.subr.msk.bf16.mxu0 %vm3070_vm11, %v2028_v16  ;;  %v2416_v16 = vunpack.i.l.bf16 %v2415_v26 }
 0x276   : > { %v868_v3 = vsel %vm3755_vm5, %v2391_v6, %v2381_v18  ;;  %v1030_v18 = vsel %vm3206_vm10, %v1020_v29, 0.0  ;;  %v2337_v6 = vunpack.i.h.bf16 %v3051_v7  ;;  %vm3765_vm5 = vcmask 588800  }
 0x277   : > { %v2031_v48 = vpack.c.bf16 %v1046_v30, %v868_v3  ;;  %v3210_v27 = vpop.permute.xlu0 %2424  ;;  %v2400_v52 = vpop.permute.xlu1 %2399  ;;  %v3228_v30 = vld [vmem:[%s3723_s6] sm:$0xf]  ;;  %v3833_v3 = vmov 0  ;;  %v1125_v22 = vpack.c.bf16 %v1030_v18, %v1030_v18 }
 0x278   : > { %v2402_v32 = vunpack.i.h.bf16 %v2400_v52  ;;  %v2401_v5 = vunpack.i.l.bf16 %v2400_v52  ;;  %v3834_v3 = vsel %vm3230_vm14, 4294967295, %v3833_v3  ;;  %v2411_v52 = vunpack.i.l.bf16 %v3175_v11 }
 0x279   : > { %2032 = vmatpush1.bf16.msk.msra.mxu0 %vm3095_vm15, %v2031_v48  ;;  %v2417_v48 = vunpack.i.h.bf16 %v2415_v26  ;;  %v1095_v1 = vsel %vm3774_vm6, %v2337_v6, %v2416_v16  ;;  %v3837_v26 = vmov 0 }
 0x27a   : > { %v1021_v29 = vsel %vm3762_vm4, %v2317_v40, %v2401_v5  ;;  %v1022_v7 = vsel %vm3762_vm4, %v2401_v5, %v2402_v32  ;;  %2167 = vmatprep.subr.bf16.mxu0 %v3772_v61  ;;  %vm3250_vm4 = vcmp.ge.s32.totalorder %v440_v34, 1  ;;  %v3835_v40 = vmov 0 }
 0x27b   : > { %v1031_v39 = vsel %vm3212_vm13, %v1021_v29, 0.0  ;;  %v3241_v2 = vpop.permute.xlu0 %2429  ;;  %v3243_v0 = vpop.permute.xlu1 %2404  ;;  %v1032_v9 = vsel %vm3216_vm3, %v1022_v7, 0.0  ;;  %v3836_v40 = vsel %vm3250_vm4, 4294967295, %v3835_v40  ;;  %v3838_v26 = vsel %vm3254_vm0, 4294967295, %v3837_v26 }
 0x27c   : > { %2033 = vmatmul.mubr.msk.bf16.vlgmr.msra.gmra.mxu0 %vm3765_vm5, %v3228_v30  ;;  %v2357_v32 = vunpack.i.h.bf16 %v3123_v4  ;;  %v2412_v5 = vunpack.i.h.bf16 %v3175_v11  ;;  %v1126_v18 = vpack.c.bf16 %v1031_v39, %v1031_v39  ;;  %v1127_v29 = vpack.c.bf16 %v1032_v9, %v1032_v9 }
 0x27d   : > { %2177 = vmatprep.mubr.msk.bf16.mxu0 %vm3770_vm12, %v3772_v61  ;;  %v1094_v34 = vsel %vm3774_vm6, %v2327_v28, %v2337_v6  ;;  %v3839_v7 = vunpack.i.h.bf16 %v3023_v8  ;;  %vm3840_vm5 = vcmask 400384   ;;  %v2426_v4 = vunpack.i.l.bf16 %v3210_v27 }
 0x27e   : > { %vm3841_vm9 = vmmov %vm3840_vm5  ;;  %v1096_v11 = vsel %vm3774_vm6, %v2416_v16, %v2417_v48  ;;  %vm3845_vm12 = vcmask 1043456   ;;  %v2352_v9 = vunpack.i.h.bf16 %v3114_v50  ;;  %v3850_v16 = vunpack.i.h.bf16 %v3081_v41 }
 0x27f   : > { %v992_v62 = vsel %vm3840_vm5, %v3839_v7, %v2332_v43  ;;  %v993_v23 = vsel %vm3841_vm9, %v2332_v43, %v2411_v52  ;;  %2034 = vmatprep.subr.msk.bf16.mxu1 %vm3845_vm12, %v1126_v18  ;;  %v3279_v28 = vpop.permute.xlu0 %2444  ;;  %v2420_v8 = vpop.permute.xlu1 %2419  ;;  %vm3846_vm5 = vmmov %vm3845_vm12  ;;  %vm3851_vm12 = vcmask 523264   ;;  %v2427_v50 = vunpack.i.h.bf16 %v3210_v27 }
 0x280   : > { %v2036_v51 = vpack.c.bf16 %v1095_v1, %v993_v23  ;;  %v1145_v6 = vsel %vm3846_vm5, %v1125_v22, 0  ;;  %vm3847_vm9 = vmmov %vm3846_vm5  ;;  %v2422_v7 = vunpack.i.h.bf16 %v2420_v8  ;;  %v2421_v61 = vunpack.i.l.bf16 %v2420_v8 }
 0x281   : > { %v1151_v43 = vsel %vm3847_vm9, %v1127_v29, 0  ;;  %1201 = vmatpush1.bf16.msra.mxu1 %v1145_v6  ;;  %vm3287_vm6 = vmpackc.low %vm3842_vm2, %vm3250_vm4  ;;  %v3848_v23 = vmov 0  ;;  %v2039_v1 = vpack.c.bf16 %v1094_v34, %v992_v62  ;;  %v1071_v22 = vsel %vm3851_vm12, %v3850_v16, %v2357_v32 }
 0x282   : > { %2168 = vmatpush3.bf16.msra.mxu0 %v1151_v43  ;;  %v3849_v23 = vsel %vm3287_vm6, 4294967295, %v3848_v23  ;;  %vm3852_vm5 = vcmask 400384   ;;  %2037 = vmatprep.subr.msk.bf16.mxu1 %vm3273_vm1, %v2036_v51  ;;  %v3853_v18 = vmov 0.0   ;;  %vm3302_vm9 = vmpackc.low %vm3842_vm2, %vm3254_vm0  ;;  %v3854_v29 = vmov 0 }
 0x283   : > { %v994_v48 = vsel %vm3852_vm5, %v2411_v52, %v2412_v5  ;;  %2169 = vmatprep.subr.bf16.mxu0 %v3853_v18  ;;  %v3855_v29 = vsel %vm3302_vm9, 4294967295, %v3854_v29  ;;  %vm3856_vm15 = vmmov %vm3851_vm12  ;;  %v2431_v62 = vunpack.i.l.bf16 %v3241_v2  ;;  %vm3857_vm12 = vcmask 515072   ;;  %v3318_v6 = vpop.permute.xlu0 %2449 }
 0x284   : > { %v2061_v34 = vpack.c.bf16 %v1096_v11, %v994_v48  ;;  %v1072_v41 = vsel %vm3856_vm15, %v2357_v32, %v2426_v4  ;;  %v965_v52 = vsel %vm3857_vm12, %v2352_v9, %v2421_v61  ;;  %vm3312_vm5 = vmpackc.low %vm3212_vm13, %vm3842_vm2  ;;  %v3858_v27 = vmov 0  ;;  %v2435_v11 = vpop.permute.xlu1 %2434 }
 0x285   : > { %v3859_v27 = vsel %vm3312_vm5, 4294967295, %v3858_v27  ;;  %v2372_v5 = vunpack.i.h.bf16 %v3158_v46  ;;  %vm3860_vm11 = vmmov %vm3857_vm12  ;;  %v2042_v8 = vpack.c.bf16 %v965_v52, %v1072_v41  ;;  %v3861_v32 = vunpack.i.h.bf16 %v3083_v58  ;;  %2040 = vmatpush1.bf16.msk.msra.mxu1 %vm3287_vm6, %v2039_v1 }
 0x286   : > { %v966_v51 = vsel %vm3860_vm11, %v2421_v61, %v2422_v7  ;;  %vm3862_vm15 = vmmov %vm3860_vm11  ;;  %v2377_v16 = vunpack.i.h.bf16 %v3121_v56  ;;  %v2437_v48 = vunpack.i.h.bf16 %v2435_v11  ;;  %v2436_v25 = vunpack.i.l.bf16 %v2435_v11  ;;  %2170 = vmatpush3.bf16.msk.msra.mxu0 %vm3302_vm9, %v2061_v34 }
 0x287   : > { %v964_v43 = vsel %vm3862_vm15, %v3861_v32, %v2352_v9  ;;  %vm3331_vm11 = vmpackc.low %vm3206_vm10, %vm3842_vm2  ;;  %v2271_v58 = vunpack.i.l.bf16 %v2875_v59  ;;  %vm3865_vm12 = vcmask 523264   ;;  %v2432_v9 = vunpack.i.h.bf16 %v3241_v2  ;;  %2043 = vmatprep.subr.msk.bf16.mxu1 %vm3312_vm5, %v2042_v8  ;;  %2171 = vmatprep.subr.bf16.mxu0 %v3853_v18  ;;  %v3360_v11 = vpop.permute.xlu0 %2459 }
 0x288   : > { %v2045_v46 = vpack.c.bf16 %v964_v43, %v1071_v22  ;;  %v1073_v56 = vsel %vm3865_vm12, %v2426_v4, %v2427_v50  ;;  %vm3344_vm15 = vmpackc.low %vm3216_vm3, %vm3842_vm2  ;;  %v3866_v7 = vmov 0  ;;  %vm3868_vm9 = vcmask 646144   ;;  %v2440_v32 = vpop.permute.xlu1 %2439 }
 0x289   : > { %v3867_v7 = vsel %vm3344_vm15, 4294967295, %v3866_v7  ;;  %v909_v1 = vsel %vm3868_vm9, %v2372_v5, %v2431_v62  ;;  %v2446_v22 = vunpack.i.l.bf16 %v3279_v28  ;;  %v2064_v34 = vpack.c.bf16 %v966_v51, %v1073_v56  ;;  %vm3787_vm5 = vmpackc.low %vm3230_vm14, %vm3212_vm13 }
 0x28a   : > { %vm3869_vm12 = vcmask 531456   ;;  %v3870_v2 = vunpack.i.h.bf16 %v3139_v38  ;;  %vm3871_vm6 = vmmov %vm3868_vm9  ;;  %v2392_v41 = vunpack.i.h.bf16 %v3196_v13  ;;  %v2397_v51 = vunpack.i.h.bf16 %v3156_v45  ;;  %2046 = vmatpush1.bf16.msk.msra.mxu1 %vm3331_vm11, %v2045_v46 }
 0x28b   : > { %v937_v4 = vsel %vm3869_vm12, %v2377_v16, %v2436_v25  ;;  %vm3872_vm2 = vmmov %vm3869_vm12  ;;  %v2442_v43 = vunpack.i.h.bf16 %v2440_v32  ;;  %v2441_v56 = vunpack.i.l.bf16 %v2440_v32  ;;  %2172 = vmatpush3.bf16.msk.msra.mxu0 %vm3344_vm15, %v2064_v34  ;;  %v3873_v13 = vunpack.i.h.bf16 %v2875_v59 }
 0x28c   : > { %v908_v50 = vsel %vm3871_vm6, %v3870_v2, %v2372_v5  ;;  %v938_v52 = vsel %vm3872_vm2, %v2436_v25, %v2437_v48  ;;  %v2048_v8 = vpack.c.bf16 %v937_v4, %v909_v1  ;;  %vm3874_vm9 = vcmask 384000   ;;  %vm3876_vm12 = vmmov %vm3872_vm2  ;;  %2173 = vmatprep.subr.bf16.mxu0 %v3853_v18  ;;  %v3395_v1 = vpop.permute.xlu0 %1344  ;;  %v3397_v34 = vpop.permute.xlu1 %2454 }
 0x28d   : > { %v1437_v25 = vsel %vm3874_vm9, %v2271_v58, %v3873_v13  ;;  %v3875_v38 = vunpack.i.h.bf16 %v3112_v49  ;;  %vm3877_vm2 = vmmov %vm3871_vm6  ;;  %v2447_v48 = vunpack.i.h.bf16 %v3279_v28  ;;  %vm3878_vm6 = vcmask 654336  }
 0x28e   : > { %v910_v5 = vsel %vm3877_vm2, %v2431_v62, %v2432_v9  ;;  %2049 = vmatprep.subr.msk.bf16.mxu1 %vm3787_vm5, %v2048_v8  ;;  %vm3786_vm9 = vmpackc.low %vm3254_vm0, %vm3216_vm3  ;;  %v1049_v49 = vsel %vm3878_vm6, %v2397_v51, %v2446_v22  ;;  %v3880_v28 = vunpack.i.h.bf16 %v3177_v44  ;;  %v2277_v4 = vunpack.i.h.bf16 %v2877_v60 }
 0x28f   : > { %v936_v45 = vsel %vm3876_vm12, %v3875_v38, %v2377_v16  ;;  %v2067_v16 = vpack.c.bf16 %v938_v52, %v910_v5  ;;  %vm3879_vm12 = vcmask 662528   ;;  %v1448_v2 = vsel %vm3040_vm8, %v2886_v63, 0.0  ;;  %vm3883_vm6 = vmpackc.low %vm3250_vm4, %vm3206_vm10 }
 0x290   : > { %v2051_v59 = vpack.c.bf16 %v936_v45, %v908_v50  ;;  %v871_v62 = vsel %vm3879_vm12, %v2392_v41, %v2441_v56  ;;  %vm3881_vm2 = vmmov %vm3879_vm12  ;;  %v1447_v44 = vsel %vm3031_vm7, %v1437_v25, 0.0  ;;  %v2302_v50 = vunpack.i.h.bf16 %v3015_v31  ;;  %v3426_v25 = vpop.permute.xlu0 %2474  ;;  %v3428_v38 = vpop.permute.xlu1 %2464 }
 0x291   : > { %v870_v58 = vsel %vm3881_vm2, %v3880_v28, %v2392_v41  ;;  %vm3882_vm15 = vmmov %vm3881_vm2  ;;  %v2054_v9 = vpack.c.bf16 %v1049_v49, %v871_v62  ;;  %2174 = vmatpush3.bf16.msk.msra.mxu0 %vm3786_vm9, %v2067_v16  ;;  %v2301_v41 = vunpack.i.l.bf16 %v3015_v31  ;;  %v3884_v63 = vunpack.i.h.bf16 %v3137_v35  ;;  %v3931_v31 = vld [vmem:[#allocation15_spill] sm:$0xff] }
 0x292   : > { %v872_v46 = vsel %vm3882_vm15, %v2441_v56, %v2442_v43  ;;  %2052 = vmatpush1.bf16.msk.msra.mxu1 %vm3883_vm6, %v2051_v59  ;;  %vm3885_vm15 = vcmask 654336   ;;  %2175 = vmatprep.subr.bf16.mxu0 %v3853_v18  ;;  %v3793_v32 = vunpack.i.h.bf16 %v3017_v42  ;;  %v2306_v43 = vunpack.i.l.bf16 %v3017_v42 }
 0x293   : > { %v1048_v52 = vsel %vm3885_vm15, %v3884_v63, %v2397_v51  ;;  %vm3886_vm12 = vmmov %vm3885_vm15  ;;  %2055 = vmatprep.subr.msk.bf16.mxu1 %vm3273_vm1, %v2054_v9  ;;  %v1541_v35 = vpack.c.bf16 %v1448_v2, %v1448_v2  ;;  %v1540_v45 = vpack.c.bf16 %v1447_v44, %v1447_v44  ;;  %v3887_v51 = vunpack.i.l.bf16 %v2877_v60 }
 0x294   : > { %v1050_v8 = vsel %vm3886_vm12, %v2446_v22, %v2447_v48  ;;  %v2057_v56 = vpack.c.bf16 %v1048_v52, %v870_v58  ;;  %vm3888_vm2 = vcmask 384000   ;;  %vm3889_vm6 = vnez %v3849_v23  ;;  %v1291_v28 = vpop.permute.xlu0 %1290  ;;  %v2470_v58 = vpop.permute.xlu1 %2469  ;;  %v1860_v23 = vld [vmem:[%s2786_s15 + $0x10] sm:$0xff] }
 0x295   : > { %v2070_v13 = vpack.c.bf16 %v1050_v8, %v872_v46  ;;  %v1439_v22 = vsel %vm3888_vm2, %v3887_v51, %v2277_v4  ;;  %vm3890_vm15 = vnez %v3855_v29  ;;  %vm3891_vm12 = vcmask 515072   ;;  %1868 = vrot.lane.b32.xlu0 %v1860_v23, %s2620_s27  ;;  %v1881_v29 = vld [vmem:[%s2786_s15 + $0x20] sm:$0xff] }
 0x296   : > { %2058 = vmatpush1.bf16.msk.msra.mxu1 %vm3889_vm6, %v2057_v56  ;;  %v1384_v5 = vsel %vm3891_vm12, %v2301_v41, %v2302_v50  ;;  %vm3892_vm9 = vcmask 1043456   ;;  %vm3893_vm5 = vcmask 523264   ;;  %v2451_v60 = vunpack.i.l.bf16 %v3318_v6 }
 0x297   : > { %2176 = vmatpush3.bf16.msk.msra.mxu0 %vm3890_vm15, %v2070_v13  ;;  %2074 = vmatprep.subr.msk.bf16.mxu1 %vm3892_vm9, %v1541_v35  ;;  %v1487_v48 = vsel %vm3893_vm5, %v2306_v43, %v3793_v32  ;;  %v3790_v59 = vunpack.i.h.bf16 %v3360_v11  ;;  %v2461_v49 = vunpack.i.l.bf16 %v3360_v11  ;;  %v3791_v16 = vunpack.i.h.bf16 %v3397_v34 }
 0x298   : > { %v2456_v62 = vunpack.i.l.bf16 %v3397_v34  ;;  %vm3894_vm2 = vcmask 588800   ;;  %v1566_v46 = vsel %vm3892_vm9, %v1540_v45, 0  ;;  %v1449_v9 = vsel %vm3206_vm10, %v1439_v22, 0.0  ;;  %v2485_v22 = vpop.permute.xlu0 %2484 }
 0x299   : > { %2059 = vmatmul.mubr.msk.bf16.vlgmr.msra.gmra.mxu1 %vm3894_vm2, %v3228_v30  ;;  %vm3895_vm12 = vmmov %vm3894_vm2  ;;  %v2471_v2 = vunpack.i.l.bf16 %v2470_v58  ;;  %v3896_v44 = vmov 0   ;;  %v2082_v63 = vpack.c.bf16 %v1384_v5, %v1487_v48  ;;  %v2406_v52 = vunpack.i.l.bf16 %v3243_v0  ;;  %v3475_v5 = vpop.permute.xlu1 %2479  ;;  %1888 = vrot.lane.b32.xlu0 %v1881_v29, %s2620_s27 }
 0x29a   : > { %2178 = vmatmul.mubr.msk.bf16.vlgmr.msra.gmra.mxu0 %vm3895_vm12, %v3228_v30  ;;  %1587 = vmatpush1.bf16.msra.mxu1 %v1566_v46  ;;  %v3897_v8 = vpack.c.bf16 %v2892_v12, %v2889_v10  ;;  %vm3898_vm5 = vnez %v3818_v36  ;;  %vm3899_vm2 = vcmask 523264   ;;  %vm3900_vm12 = vcmask 531456   ;;  %v3535_v36 = vld [vmem:[%s3725_s8] sm:$0xff]  }
 0x29b   : > { %1612 = vmatprep.mubr.bf16.mxu1 %v3896_v44  ;;  %1655 = vmatprep.mubr.bf16.mxu0 %v3896_v44  ;;  %v1486_v30 = vsel %vm3899_vm2, %v2451_v60, %v2306_v43  ;;  %v1357_v56 = vsel %vm3900_vm12, %v2461_v49, %v3790_v59  ;;  %vm3901_vm9 = vcmask 384000   ;;  %v1542_v35 = vpack.c.bf16 %v1449_v9, %v1449_v9 }
 0x29c   : > { %2077 = vmatprep.subr.msk.bf16.mxu1 %vm3898_vm5, %v3897_v8  ;;  %v1440_v13 = vsel %vm3901_vm9, %v2277_v4, %v2471_v2  ;;  %vm3902_vm0 = vcmask 646144   ;;  %v2466_v10 = vunpack.i.l.bf16 %v3428_v38  ;;  %v2472_v12 = vunpack.i.h.bf16 %v2470_v58 }
 0x29d   : > { %v1330_v45 = vsel %vm3902_vm0, %v2456_v62, %v3791_v16  ;;  %v1450_v51 = vsel %vm3212_vm13, %v1440_v13, 0.0  ;;  %v2477_v43 = vunpack.i.h.bf16 %v3426_v25  ;;  %v2476_v48 = vunpack.i.l.bf16 %v3426_v25 }
 0x29e   : > { %v2482_v4 = vunpack.i.h.bf16 %v3475_v5  ;;  %v2481_v60 = vunpack.i.l.bf16 %v3475_v5  ;;  %v3903_v46 = vpack.c.bf16 %v2913_v24, %v2905_v20  ;;  %vm3904_vm0 = vnez %v3822_v21  ;;  %v3495_v24 = vpop.permute.xlu0 %2494 }
 0x29f   : > { %vm3905_vm2 = vcmask 515072   ;;  %vm3906_vm12 = vnez %v3824_v47  ;;  %v1543_v9 = vpack.c.bf16 %v1450_v51, %v1450_v51  ;;  %vm3907_vm9 = vcmask 1043456  }
 0x2a0   : > { %2080 = vmatpush1.bf16.msk.msra.mxu1 %vm3904_vm0, %v3903_v46  ;;  %v1383_v58 = vsel %vm3905_vm2, %v2406_v52, %v2301_v41  ;;  %v1572_v13 = vsel %vm3907_vm9, %v1542_v35, 0  ;;  %vm3908_vm10 = vcmask 531456   ;;  %v2088_v16 = vpack.c.bf16 %v1357_v56, %v1330_v45  ;;  %vm3911_vm14 = vmmov %vm3907_vm9  ;;  %v1453_v41 = vpop.permute.xlu1 %1452 }
 0x2a1   : > { %2083 = vmatprep.subr.msk.bf16.mxu1 %vm3906_vm12, %v2082_v63  ;;  %v2085_v8 = vpack.c.bf16 %v1383_v58, %v1486_v30  ;;  %v1356_v59 = vsel %vm3908_vm10, %v3395_v1, %v2461_v49  ;;  %vm3909_vm4 = vcmask 646144   ;;  %vm3910_vm13 = vcmask 384000   ;;  %2100 = vmatprep.subr.msk.bf16.mxu0 %vm3911_vm14, %v1543_v9  ;;  %v3932_v58 = vld [vmem:[#allocation14_spill] sm:$0xff] }
 0x2a2   : > { %v1329_v32 = vsel %vm3909_vm4, %v2466_v10, %v2456_v62  ;;  %v1441_v20 = vsel %vm3910_vm13, %v2471_v2, %v2472_v12  ;;  %vm3912_vm2 = vcmask 662528   ;;  %vm3913_vm12 = vcmask 654336   ;;  %1630 = vmatpush1.bf16.msra.mxu0 %v1572_v13 }
 0x2a3   : > { %v1303_v47 = vsel %vm3912_vm2, %v2476_v48, %v2477_v43  ;;  %v1465_v63 = vsel %vm3913_vm12, %v2481_v60, %v2482_v4  ;;  %vm3914_vm10 = vnez %v3826_v33  ;;  %vm3915_vm4 = vnez %v3816_v19  ;;  %vm3917_vm14 = vmmov %vm3913_vm12 }
 0x2a4   : > { %2086 = vmatpush1.bf16.msk.msra.mxu1 %vm3914_vm10, %v2085_v8  ;;  %vm3916_vm13 = vmpackc.low %vm3915_vm4, %vm3040_vm8  ;;  %v2091_v1 = vpack.c.bf16 %v1356_v59, %v1329_v32  ;;  %v2486_v49 = vunpack.i.l.bf16 %v2485_v22  ;;  %v1451_v62 = vsel %vm3216_vm3, %v1441_v20, 0.0  ;;  %v2094_v2 = vpack.c.bf16 %v1465_v63, %v1303_v47  ;;  %v2490_v30 = vpop.permute.xlu1 %2489  ;;  %v3521_v59 = vpop.permute.xlu0 %1325 }
 0x2a5   : > { %2089 = vmatprep.subr.msk.bf16.mxu1 %vm3916_vm13, %v2088_v16  ;;  %v1464_v52 = vsel %vm3917_vm14, %v1453_v41, %v2481_v60  ;;  %v2407_v56 = vunpack.i.h.bf16 %v3243_v0  ;;  %v2491_v33 = vunpack.i.l.bf16 %v2490_v30  ;;  %vm3918_vm9 = vnez %v3820_v37 }
 0x2a6   : > { %vm3919_vm2 = vmpackc.low %vm3918_vm9, %vm3031_vm7  ;;  %v2452_v57 = vunpack.i.h.bf16 %v3318_v6  ;;  %vm3920_vm8 = vcmask 662528   ;;  %v2487_v32 = vunpack.i.h.bf16 %v2485_v22  ;;  %v1544_v16 = vpack.c.bf16 %v1451_v62, %v1451_v62 }
 0x2a7   : > { %v1302_v19 = vsel %vm3920_vm8, %v1291_v28, %v2476_v48  ;;  %v3921_v0 = vunpack.i.h.bf16 %v2896_v14  ;;  %vm3922_vm12 = vcmask 400384   ;;  %v2496_v37 = vunpack.i.l.bf16 %v3495_v24 }
 0x2a8   : > { %2092 = vmatpush1.bf16.msk.msra.mxu1 %vm3919_vm2, %v2091_v1  ;;  %v2097_v53 = vpack.c.bf16 %v1464_v52, %v1302_v19  ;;  %v3923_v45 = vunpack.i.h.bf16 %v2898_v15  ;;  %vm3924_vm7 = vcmask 392192   ;;  %v2492_v10 = vunpack.i.h.bf16 %v2490_v30  ;;  %v2500_v12 = vpop.permute.xlu1 %2499  ;;  %vm3928_vm4 = vmmov %vm3922_vm12  ;;  %v2510_v8 = vpop.permute.xlu0 %2509 }
 0x2a9   : > { %2095 = vmatprep.subr.msk.bf16.mxu1 %vm3898_vm5, %v2094_v2  ;;  %v1413_v35 = vsel %vm3922_vm12, %v3921_v0, %v2486_v49  ;;  %v2501_v51 = vunpack.i.l.bf16 %v2500_v12  ;;  %vm3925_vm5 = vcmask 515072   ;;  %v3926_v15 = vunpack.i.h.bf16 %v3017_v42  ;;  %vm3935_vm9 = vmmov %vm3924_vm7 }
 0x2aa   : > { %v1511_v6 = vsel %vm3924_vm7, %v3923_v45, %v2491_v33  ;;  %v1385_v14 = vsel %vm3925_vm5, %v2302_v50, %v2407_v56  ;;  %vm3927_vm10 = vcmask 523264   ;;  %v2467_v48 = vunpack.i.h.bf16 %v3428_v38  ;;  %vm3929_vm13 = vmmov %vm3925_vm5 }
 0x2ab   : > { %v2102_v28 = vpack.c.bf16 %v1511_v6, %v1413_v35  ;;  %v1488_v22 = vsel %vm3927_vm10, %v3926_v15, %v2452_v57  ;;  %v1414_v60 = vsel %vm3928_vm4, %v2486_v49, %v2487_v32  ;;  %v1386_v21 = vsel %vm3929_vm13, %v2407_v56, %v2496_v37 }
 0x2ac   : > { %2098 = vmatpush1.bf16.msk.msra.mxu1 %vm3904_vm0, %v2097_v53  ;;  %vm3930_vm0 = vmmov %vm3927_vm10  ;;  %v3933_v50 = vpack.c.bf16 %v3931_v31, %v3932_v58  ;;  %vm3934_vm14 = vcmask 1043456   ;;  %v2497_v38 = vunpack.i.h.bf16 %v3495_v24  ;;  %v1512_v9 = vsel %vm3935_vm9, %v2491_v33, %v2492_v10  ;;  %v2505_v41 = vpop.permute.xlu1 %2504 }
 0x2ad   : > { %2103 = vmatprep.subr.msk.bf16.mxu0 %vm3273_vm1, %v2102_v28  ;;  %2181 = vmatprep.subr.bf16.mxu1 %v3853_v18  ;;  %v1489_v46 = vsel %vm3930_vm0, %v2452_v57, %v2501_v51  ;;  %v1578_v42 = vsel %vm3934_vm14, %v1544_v16, 0  ;;  %v2502_v13 = vunpack.i.h.bf16 %v2500_v12  ;;  %vm3936_vm2 = vcmask 588800   ;;  %v1882_v28 = vld [vmem:[%s2786_s15 + $0x28] sm:$0xff] }
 0x2ae   : > { %2106 = vmatpush1.bf16.msk.msra.mxu0 %vm3889_vm6, %v3933_v50  ;;  %v2108_v20 = vpack.c.bf16 %v1386_v21, %v1489_v46  ;;  %v2111_v47 = vpack.c.bf16 %v1385_v14, %v1488_v22  ;;  %v2512_v63 = vunpack.i.h.bf16 %v2510_v8  ;;  %v2507_v1 = vunpack.i.h.bf16 %v2505_v41 }
 0x2af   : > { %2099 = vmatmul.mubr.msk.bf16.vlgmr.msra.gmra.mxu1 %vm3936_vm2, %v3535_v36  ;;  %v2506_v49 = vunpack.i.l.bf16 %v2505_v41  ;;  %vm3937_vm8 = vmmov 0   ;;  %v3938_v62 = vunpack.i.h.bf16 %v3397_v34  ;;  %vm3939_vm12 = vcmask 646144  }
 0x2b0   : > { %2182 = vmatpush3.bf16.msra.mxu1 %v1578_v42  ;;  %2191 = vmatprep.mubr.msk.bf16.mxu1 %vm3937_vm8, %v3853_v18  ;;  %vm3940_vm7 = vmmov %vm3939_vm12  ;;  %vm3941_vm5 = vnez %v3859_v27  ;;  %v2127_v52 = vpack.c.bf16 %v1512_v9, %v1414_v60  ;;  %v2511_v30 = vunpack.i.l.bf16 %v2510_v8  ;;  %v3942_v56 = vunpack.i.h.bf16 %v3360_v11  ;;  %v2515_v16 = vpop.permute.xlu1 %2514  ;;  %v1328_v11 = vpop.permute.xlu0 %1327 }
 0x2b1   : > { %v1331_v24 = vsel %vm3939_vm12, %v3938_v62, %v2467_v48  ;;  %v1332_v2 = vsel %vm3940_vm7, %v2467_v48, %v3521_v59  ;;  %2109 = vmatprep.subr.msk.bf16.mxu0 %vm3941_vm5, %v2108_v20  ;;  %2183 = vmatprep.subr.bf16.mxu1 %v3853_v18  ;;  %vm3943_vm10 = vcmask 531456   ;;  %v1387_v34 = vsel %vm3929_vm13, %v2496_v37, %v2497_v38 }
 0x2b2   : > { %v1358_v33 = vsel %vm3943_vm10, %v3942_v56, %v2506_v49  ;;  %vm3944_vm4 = vmmov %vm3943_vm10  ;;  %2112 = vmatpush1.bf16.msk.msra.mxu0 %vm3331_vm11, %v2111_v47  ;;  %v1490_v19 = vsel %vm3930_vm0, %v2501_v51, %v2502_v13  ;;  %vm3945_vm14 = vcmask 662528   ;;  %v2517_v35 = vunpack.i.h.bf16 %v2515_v16 }
 0x2b3   : > { %v1359_v57 = vsel %vm3944_vm4, %v2506_v49, %v2507_v1  ;;  %v2117_v27 = vpack.c.bf16 %v1358_v33, %v1331_v24  ;;  %v1305_v0 = vsel %vm3945_vm14, %v2511_v30, %v2512_v63  ;;  %v2516_v53 = vunpack.i.l.bf16 %v2515_v16  ;;  %vm3949_vm12 = vmmov %vm3945_vm14 }
 0x2b4   : > { %v2114_v32 = vpack.c.bf16 %v1359_v57, %v1332_v2  ;;  %2184 = vmatpush3.bf16.msk.msra.mxu1 %vm3890_vm15, %v2127_v52  ;;  %vm3946_vm9 = vnez %v3834_v3  ;;  %vm3947_vm2 = vnez %v3830_v17  ;;  %v1304_v61 = vsel %vm3949_vm12, %v2477_v43, %v2511_v30  ;;  %v1355_v10 = vpop.permute.xlu1 %1354  ;;  %v1301_v5 = vpop.permute.xlu0 %1300 }
 0x2b5   : > { %vm3948_vm11 = vmpackc.low %vm3946_vm9, %vm3947_vm2  ;;  %2185 = vmatprep.subr.bf16.mxu1 %v3853_v18  ;;  %v2130_v37 = vpack.c.bf16 %v1387_v34, %v1490_v19  ;;  %vm3950_vm7 = vcmask 654336   ;;  %vm3952_vm10 = vnez %v3836_v40  ;;  %vm3953_vm4 = vnez %v3828_v54 }
 0x2b6   : > { %2115 = vmatprep.subr.msk.bf16.mxu0 %vm3948_vm11, %v2114_v32  ;;  %v1466_v45 = vsel %vm3950_vm7, %v2482_v4, %v2516_v53  ;;  %vm3951_vm5 = vmmov %vm3950_vm7  ;;  %vm3955_vm0 = vcmask 646144   ;;  %vm3956_vm14 = vcmask 531456   ;;  %vm3957_vm9 = vnez %v3867_v7 }
 0x2b7   : > { %v1467_v6 = vsel %vm3951_vm5, %v2516_v53, %v2517_v35  ;;  %vm3954_vm13 = vmpackc.low %vm3952_vm10, %vm3953_vm4  ;;  %v2123_v3 = vpack.c.bf16 %v1466_v45, %v1304_v61  ;;  %v1333_v25 = vsel %vm3955_vm0, %v3521_v59, %v1328_v11  ;;  %v1360_v43 = vsel %vm3956_vm14, %v2507_v1, %v1355_v10  ;;  %v1880_v59 = vld [vmem:[%s2786_s15 + $0x18] sm:$0xff] }
 0x2b8   : > { %2118 = vmatpush1.bf16.msk.msra.mxu0 %vm3954_vm13, %v2117_v27  ;;  %v2120_v17 = vpack.c.bf16 %v1467_v6, %v1305_v0  ;;  %2186 = vmatpush3.bf16.msk.msra.mxu1 %vm3957_vm9, %v2130_v37  ;;  %v2133_v4 = vpack.c.bf16 %v1360_v43, %v1333_v25  ;;  %v1463_v54 = vpop.permute.xlu1 %1462  ;;  %vm3958_vm2 = vmmov %vm3949_vm12  ;;  %vm3960_vm12 = vnez %v3838_v26  ;;  %v1859_v26 = vld [vmem:[%s2786_s15 + $0x8] sm:$0xff]  ;;  %v1550_v12 = vpop.permute.xlu0 %1549  ;;  %v1717_v0 = vld [vmem:[%s3727_s10] sm:$0xf] }
 0x2b9   : > { %2187 = vmatprep.subr.bf16.mxu1 %v3853_v18  ;;  %v1306_v40 = vsel %vm3958_vm2, %v2512_v63, %v1301_v5  ;;  %vm3959_vm11 = vmmov %vm3951_vm5  ;;  %1866 = vrot.lane.b32.xlu1 %v1859_v26, %s2620_s27 }
 0x2ba   : > { %2121 = vmatprep.subr.msk.bf16.mxu0 %vm3273_vm1, %v2120_v17  ;;  %v1468_v7 = vsel %vm3959_vm11, %v2517_v35, %v1463_v54  ;;  %vm3961_vm7 = vmpackc.low %vm3960_vm12, %vm3216_vm3  ;;  %vm3962_vm1 = vcmask 588800   ;;  %vm1729_vm3 = vcmask 130048  }
 0x2bb   : > { %v2136_v39 = vpack.c.bf16 %v1468_v7, %v1306_v40 }
 0x2bc   : > { %2124 = vmatpush1.bf16.msk.msra.mxu0 %vm3889_vm6, %v2123_v3  ;;  %2188 = vmatpush3.bf16.msk.msra.mxu1 %vm3961_vm7, %v2133_v4  ;;  %vm3963_vm6 = vmmov %vm3962_vm1 }
 0x2bd   : > { %2189 = vmatprep.subr.bf16.mxu1 %v3853_v18  ;;  %1886 = vrot.lane.b32.xlu1 %v1880_v59, %s2620_s27 }
 0x2bf   : > { %2125 = vmatmul.mubr.msk.bf16.vlgmr.msra.gmra.mxu0 %vm3962_vm1, %v3535_v36 }
 0x2c0   : > { %1765 = vmatprep.mubr.bf16.mxu0 %v3896_v44  ;;  %2190 = vmatpush3.bf16.msk.msra.mxu1 %vm3890_vm15, %v2136_v39  ;;  %v1555_v49 = vpop.permute.xlu1 %1554  ;;  %vm3964_vm15 = vcmask 523264  }
 0x2c1   : > { %1890 = vrot.lane.b32.xlu1 %v1882_v28, %s2620_s27 }
 0x2c3   : > { %2192 = vmatmul.mubr.msk.bf16.vlgmr.msra.gmra.mxu1 %vm3963_vm6, %v3535_v36 }
 0x2c4   : > { %1806 = vmatprep.mubr.bf16.mxu1 %v3896_v44  ;;  %v1132_v44 = vpop.permute.xlu0 %1131  ;;  %v1727_v29 = vpop.permute.xlu1 %1726 }
 0x2e4   : > { %v1865_v59 = vpop.permute.xlu0 %1864 }
 0x307   : > { %v1869_v28 = vpop.permute.xlu0 %1868 }
 0x33c   : > { %v1187_v36 = vpop.f32.mrf.mxu0 }
 0x33d   : > { %v1188_v51 = vadd.f32 %v1187_v36, %v1132_v44 }
 0x33e   : > { %v1189_v14 = vpop.f32.mrf.mxu0 }
 0x33f   : > { %v1274_v15 = vmax.f32 %v1188_v51, 0.0  ;;  %v1190_v22 = vadd.f32 %v1189_v14, %v1132_v44  ;;  %v1889_v51 = vpop.permute.xlu0 %1888 }
 0x340   : > { %v1191_v48 = vpop.f32.mrf.mxu0 }
 0x341   : > { %1876 = vst [vmem:[%s3640_s20 + $0x10] sm:$0xff] %v1274_v15  ;;  %v1275_v60 = vmax.f32 %v1190_v22, 0.0 }
 0x342   : > { %v1192_v21 = vpop.f32.mrf.mxu0 }
 0x343   : > { %1877 = vst [vmem:[%s3640_s20 + $0x18] sm:$0xff] %v1275_v60 }
 0x359   : > { %v1228_v46 = vpop.f32.mrf.mxu1 }
 0x35a   : > { %v1268_v31 = vpop.f32.mrf.mxu0 }
 0x35b   : > { %v1269_v58 = vadd.f32 %v1268_v31, %v1132_v44  ;;  %v1229_v50 = vpop.f32.mrf.mxu1 }
 0x35c   : > { %v2179_v42 = vpop.f32.mrf.mxu0  ;;  %v1230_v9 = vadd.f32 %v1229_v50, %v1132_v44 }
 0x35d   : > { %v1277_v38 = vmax.f32 %v1269_v58, 0.0  ;;  %v1231_v8 = vpop.f32.mrf.mxu1 }
 0x35e   : > { %v1271_v13 = vpop.f32.mrf.mxu0  ;;  %v1276_v20 = vmax.f32 %v1230_v9, 0.0 }
 0x35f   : > { %2145 = vst [vmem:[%s3640_s20 + $0x48] sm:$0xff] %v1277_v38  ;;  %v1232_v41 = vpop.f32.mrf.mxu1 }
 0x360   : > { %v2180_v47 = vpop.f32.mrf.mxu0  ;;  %2144 = vst [vmem:[%s3640_s20 + $0x40] sm:$0xff] %v1276_v20 }
 0x36f   : > { %v1614_v63 = vpop.f32.mrf.mxu1 }
 0x370   : > { %v1615_v52 = vadd.f32 %v1614_v63, %v1550_v12 }
 0x371   : > { %v1616_v1 = vpop.f32.mrf.mxu1 }
 0x372   : > { %v1617_v24 = vadd.f32 %v1616_v1, %v1550_v12  ;;  %v1707_v19 = vmax.f32 %v1615_v52, 0.0 }
 0x373   : > { %v1618_v62 = vpop.f32.mrf.mxu1 }
 0x374   : > { %v1619_v2 = vadd.f32 %v1618_v62, %v1555_v49  ;;  %v1708_v57 = vmax.f32 %v1617_v24, 0.0 }
 0x375   : > { %v1620_v30 = vpop.f32.mrf.mxu1 }
 0x376   : > { %v1621_v56 = vadd.f32 %v1620_v30, %v1555_v49  ;;  %v1712_v33 = vmax.f32 %v1619_v2, 0.0 }
 0x378   : > { %v1713_v34 = vmax.f32 %v1621_v56, 0.0  ;;  %v1718_v27 = vpack.c.bf16 %v1712_v33, %v1707_v19 }
 0x37a   : > { %v1719_v32 = vpack.c.bf16 %v1713_v34, %v1708_v57 }
 0x37c   : > { %1747 = vmatprep.subr.bf16.mxu0 %v1719_v32 }
 0x37d   : > { %1748 = vmatpush1.bf16.msra.mxu0 %v1718_v27 }
 0x37e   : > { %2195 = vmatprep.subr.bf16.mxu0 %v3853_v18 }
 0x37f   : > { %v1657_v16 = vpop.f32.mrf.mxu0 }
 0x380   : > { %2139 = vmatmul.mubr.msk.bf16.vlgmr.msra.gmra.mxu0 %vm1729_vm3, %v1717_v0  ;;  %v1658_v37 = vadd.f32 %v1657_v16, %v1550_v12 }
 0x381   : > { %v1659_v35 = vpop.f32.mrf.mxu0  ;;  %2197 = vmatprep.mubr.msk.bf16.mxu0 %vm3937_vm8, %v3853_v18  ;;  %vm3965_vm8 = vmmov %vm3964_vm15 }
 0x382   : > { %v1660_v11 = vadd.f32 %v1659_v35, %v1550_v12  ;;  %v1709_v4 = vmax.f32 %v1658_v37, 0.0  ;;  %vm3966_vm5 = vmmov %vm3965_vm8 }
 0x383   : > { %v1661_v53 = vpop.f32.mrf.mxu0  ;;  %v1700_v45 = vpop.f32.mrf.mxu1  ;;  %vm3967_vm10 = vmmov %vm3966_vm5 }
 0x384   : > { %v1662_v61 = vadd.f32 %v1661_v53, %v1555_v49  ;;  %v1710_v25 = vmax.f32 %v1660_v11, 0.0  ;;  %v1701_v43 = vadd.f32 %v1700_v45, %v1550_v12  ;;  %v1867_v12 = vpop.permute.xlu1 %1866 }
 0x385   : > { %v1663_v6 = vpop.f32.mrf.mxu0  ;;  %v2193_v10 = vpop.f32.mrf.mxu1  ;;  %v1870_v44 = vsel %vm3964_vm15, %v1865_v59, %v1867_v12  ;;  %v1871_v36 = vsel %vm3965_vm8, %v1867_v12, %v1869_v28 }
 0x386   : > { %v1664_v17 = vadd.f32 %v1663_v6, %v1555_v49  ;;  %v1714_v3 = vmax.f32 %v1662_v61, 0.0  ;;  %v1711_v18 = vmax.f32 %v1701_v43, 0.0  ;;  %1874 = vst [vmem:[%s3640_s20] sm:$0xff] %v1870_v44  ;;  %1875 = vst [vmem:[%s3640_s20 + $0x8] sm:$0xff] %v1871_v36 }
 0x387   : > { %v1703_v54 = vpop.f32.mrf.mxu1 }
 0x388   : > { %v1715_v5 = vmax.f32 %v1664_v17, 0.0  ;;  %v1704_v7 = vadd.f32 %v1703_v54, %v1555_v49  ;;  %v1720_v39 = vpack.c.bf16 %v1714_v3, %v1709_v4  ;;  %v1887_v14 = vpop.permute.xlu1 %1886 }
 0x389   : > { %v2194_v55 = vpop.f32.mrf.mxu1  ;;  %v1892_v15 = vsel %vm3966_vm5, %v1887_v14, %v1889_v51 }
 0x38a   : > { %v1721_v40 = vpack.c.bf16 %v1715_v5, %v1710_v25  ;;  %v1716_v26 = vmax.f32 %v1704_v7, 0.0  ;;  %2142 = vst [vmem:[%s3640_s20 + $0x30] sm:$0xff] %v1892_v15 }
 0x38c   : > { %1788 = vmatprep.subr.bf16.mxu1 %v1721_v40  ;;  %v1722_v23 = vpack.c.bf16 %v1716_v26, %v1711_v18  ;;  %v1891_v22 = vpop.permute.xlu1 %1890 }
 0x38d   : > { %1789 = vmatpush1.bf16.msra.mxu1 %v1720_v39  ;;  %v1893_v48 = vsel %vm3967_vm10, %v1889_v51, %v1891_v22 }
 0x38e   : > { %2196 = vmatpush3.bf16.msra.mxu0 %v1722_v23  ;;  %2143 = vst [vmem:[%s3640_s20 + $0x38] sm:$0xff] %v1893_v48 }
 0x390   : > { %2140 = vmatmul.mubr.msk.bf16.vlgmr.msra.gmra.mxu1 %vm1729_vm3, %v1717_v0 }
 0x391   : > { %2198 = vmatmul.mubr.msk.bf16.vlgmr.msra.gmra.mxu0 %vm1729_vm3, %v1717_v0 }
 0x440   : > { %v1767_v60 = vpop.f32.mrf.mxu0 }
 0x441   : > { %v1768_v21 = vadd.f32 %v1767_v60, %v1727_v29 }
 0x442   : > { %v1769_v46 = vpop.f32.mrf.mxu0 }
 0x443   : > { %v1854_v31 = vmax.f32 %v1768_v21, 0.0  ;;  %v1770_v58 = vadd.f32 %v1769_v46, %v1727_v29 }
 0x444   : > { %v1771_v50 = vpop.f32.mrf.mxu0 }
 0x445   : > { %1878 = vst [vmem:[%s3640_s20 + $0x20] sm:$0xff] %v1854_v31  ;;  %v1855_v42 = vmax.f32 %v1770_v58, 0.0 }
 0x446   : > { %v1772_v38 = vpop.f32.mrf.mxu0 }
 0x447   : > { %1879 = vst [vmem:[%s3640_s20 + $0x28] sm:$0xff] %v1855_v42 }
 0x450   : > { %v1808_v9 = vpop.f32.mrf.mxu1 }
 0x451   : > { %v1848_v20 = vpop.f32.mrf.mxu0 }
 0x452   : > { %v1809_v8 = vpop.f32.mrf.mxu1  ;;  %v1849_v41 = vadd.f32 %v1848_v20, %v1727_v29 }
 0x453   : > { %v1810_v13 = vadd.f32 %v1809_v8, %v1727_v29  ;;  %v2199_v1 = vpop.f32.mrf.mxu0 }
 0x454   : > { %v1811_v47 = vpop.f32.mrf.mxu1  ;;  %v1857_v49 = vmax.f32 %v1849_v41, 0.0 }
 0x455   : > { %v1856_v63 = vmax.f32 %v1810_v13, 0.0  ;;  %v1851_v24 = vpop.f32.mrf.mxu0 }
 0x456   : > { %v1812_v62 = vpop.f32.mrf.mxu1  ;;  %2147 = vst [vmem:[%s3640_s20 + $0x58] sm:$0xff] %v1857_v49 }
 0x457   : > { %2146 = vst [vmem:[%s3640_s20 + $0x50] sm:$0xff] %v1856_v63  ;;  %v2200_v2 = vpop.f32.mrf.mxu0 }
 0x458   : > { %2561 = shalt.err (!%p2558_p10)
}
 0x459   : > { %s2562_s20 = scalar_lea.hbm %s3670_s13, 1536  ;;  %s2566_s18 = scalar_lea.hbm %s3969_s30, 3072 }
 0x45a   : > { %p2563_p2 = scmp.ne.s32.totalorder %s3670_s13, %s2562_s20  ;;  %p2567_p7 = scmp.lt.s32.totalorder %s3670_s13, %s3969_s30 }
 0x45b   : > { %p2568_p5 = scmp.lt.s32.totalorder %s2566_s18, %s2562_s20 }
 0x45c   : > { %p2564_p4 = pnand %p2563_p2, %p3970_p12 }
 0x45d   : > { %p2569_p6 = por %p2568_p5, %p2567_p7 }
 0x45e   : > { %p2565_p9 = pneg %p2564_p4 }
 0x460   : > { %p2570_p11 = pnand %p2569_p6, %p2565_p9 }
 0x462   : > { %2573 = shalt.err (!%p2570_p11)
}
 0x463   : > { %s2629_s23 = smov 256   ;;  %s2630_s28 = smov 16  }
 0x464   : > { %2208 = dma.vmem_to_hbm [thread:$0]  (%p3970_p12), %s3672_s16, 1536, %s3670_s13, %s1904_s25, %s2629_s23, %s2629_s23, %s2630_s28  }
 0x465 PF: > { %s3971_s26 = sld [smem:[#allocation9_spill]]  ;;  %p3974_p0 = scmp.ge.s32.totalorder %s2612_s24, 2 }
 0x466   : > { %s3972_s17 = sld [smem:[#allocation13_spill]] }
 0x46b   : > { %s1933_s19 = sand.u32 1, %s3971_s26  }
 0x46c   : > { %p3973_p13 = scmp.ne.s32.totalorder %s3972_s17, 0  ;;  %s1934_s20 = scalar_lea.sflag [#allocation5], %s1933_s19 }
 0x46e   : > { %p2215_p1 = pnand %p3974_p0, %p3973_p13 }
 0x470   : > { %p2216_p3 = pneg %p2215_p1 }
 0x472   : > { %2595 = dma.done.wait (%p2216_p3), %s1934_s20, 1536  }
 0x473   : > { %2597 = vsyncadd (%p2216_p3), %s1934_s20, 4294965760  ;;  %s3975_s24 = sld [smem:[#allocation11_spill]]  ;;  %s3978_s21 = smov %s2604_s22 }
 0x474   : > { %s3976_s15 = sld [smem:[#allocation10_spill]] }
 0x475   : > { %s3977_s23 = sld [smem:[#allocation12_spill]] }
 0x479   : > { %p25_p8 = scmp.ge.s32.totalorder %s3975_s24, 4  }
 0x47a   : > { %s3979_s22 = smov %s3976_s15 }
 0x47b   :  { %27 = sbr.rel (!%p25_p8) target bundleno = 7 (0x7), region = 114 }
 0x480   :  { %1939 = vsyncpa [#allocation4], 1 }
 0x481   :  { %1941 = vsyncpa [#allocation4 + $0x1], 1 }
 0x482   :  { %1942 = vsyncpa [#allocation5], 1 }
 0x483   :  { %1944 = vsyncpa [#allocation5 + $0x1], 1 }

</bundles_post_ra>
